<compile_context>
chip_gen: v7x
topology: tpu7x:2x2x1
jax: 0.10.0
libtpu: 0.0.40
codegen_flags: <defaults>
</compile_context>

<pallas_src>
import functools
import jax
import jax.numpy as jnp
from jax.experimental import pallas as pl
from jax.experimental.pallas import tpu as pltpu  # noqa: F401  (TPU backend assumed)


def _softmax_last(x):
    """Softmax over the last axis; denominator via approx reciprocal (EUP slot)."""
    m = jnp.max(x, axis=-1, keepdims=True)
    e = jnp.exp(x - m)
    return e * pl.reciprocal(jnp.sum(e, axis=-1, keepdims=True), approx=True)


def _layer_norm(x, g, b, eps=1e-5):
    mu = jnp.mean(x, axis=-1, keepdims=True)
    xc = x - mu
    var = jnp.mean(xc * xc, axis=-1, keepdims=True)
    return xc * jax.lax.rsqrt(var + eps) * g + b


# ---------------------------------------------------------------------------
# One fused kernel: cross-attention block + mean pool + fc_a softmax  (image)
#                   fc_gt -> softmax -> straight-through gumbel       (text)
# Single invocation (no grid): all operands fit VMEM at these shapes.
# ---------------------------------------------------------------------------
def latent_bert_kernel(inv_temp, num_classes,
                       img_ref, txt_ref, tcls_ref, u_ref, pool_ref,
                       wq_ref, bq_ref, wk_ref, bk_ref, wv_ref, bv_ref,
                       wo_ref, bo_ref, ln1g_ref, ln1b_ref,
                       w1_ref, b1_ref, w2_ref, b2_ref, ln2g_ref, ln2b_ref,
                       wa_ref, ba_ref, wgt_ref, bgt_ref,
                       dis_img_ref, dis_txt_ref):
    img2 = img_ref[...]                          # (B*Nv, D), batch-major rows
    txt2 = txt_ref[...]                          # (B*Nt, D)
    B = tcls_ref.shape[0]
    BNv, D = img2.shape
    Nv = BNv // B
    Nt = txt2.shape[0] // B
    H, _, hd = wq_ref.shape                      # head-major weights (H, D, hd)

    # ---- multi-head cross attention (image queries, text keys/values) ------
    # Residual + output-projection bias folded into the accumulator.
    acc = img2 + bo_ref[...]                                        # (B*Nv, D)
    for h in range(H):                            # 4 unrolled, clean-shaped ops
        q = (jnp.dot(img2, wq_ref[h], preferred_element_type=jnp.float32)
             + bq_ref[h]).reshape(B, Nv, hd)      # 1/sqrt(hd) pre-folded
        k = (jnp.dot(txt2, wk_ref[h], preferred_element_type=jnp.float32)
             + bk_ref[h]).reshape(B, Nt, hd)
        v = (jnp.dot(txt2, wv_ref[h], preferred_element_type=jnp.float32)
             + bv_ref[h]).reshape(B, Nt, hd)
        s = jnp.einsum('bqe,bke->bqk', q, k, preferred_element_type=jnp.float32)
        p = _softmax_last(s)                                         # (B, Nv, Nt)
        head = jnp.einsum('bqk,bke->bqe', p, v,
                          preferred_element_type=jnp.float32)        # (B, Nv, hd)
        acc = acc + jnp.dot(head.reshape(BNv, hd), wo_ref[h],
                            preferred_element_type=jnp.float32)

    x = _layer_norm(acc, ln1g_ref[...], ln1b_ref[...])
    h1 = jnp.maximum(
        jnp.dot(x, w1_ref[...], preferred_element_type=jnp.float32) + b1_ref[...],
        0.0)
    ffn = jnp.dot(h1, w2_ref[...], preferred_element_type=jnp.float32) + b2_ref[...]
    x = _layer_norm(x + ffn, ln2g_ref[...], ln2b_ref[...])

    # Mean pool over image tokens as one MXU matmul: (B, B*Nv) @ (B*Nv, D).
    align = jnp.dot(pool_ref[...], x, preferred_element_type=jnp.float32)   # (B, D)

    # dis_image = softmax(fc_a(align)); padded logit columns carry -1e30 bias.
    logits = (jnp.dot(align, wa_ref[...], preferred_element_type=jnp.float32)
              + ba_ref[...])
    dis_img_ref[...] = _softmax_last(logits)                         # (B, C_pad)

    # ---- text branch: softmax(fc_gt(text_cls)) -> straight-through gumbel ---
    eps = 1e-20
    tl = (jnp.dot(tcls_ref[...], wgt_ref[...], preferred_element_type=jnp.float32)
          + bgt_ref[...])
    probs = _softmax_last(tl)                     # softmax(fc_gt(text), dim=1)
    g = -jnp.log(-jnp.log(u_ref[...] + eps) + eps)          # gumbel noise
    y = (probs + g) * inv_temp                               # premultiplied 1/temp
    col = jax.lax.broadcasted_iota(jnp.int32, y.shape, 1)
    y = jnp.where(col < num_classes, y, -1e30)               # keep padded cols out
    y = _softmax_last(y)                                     # masked_softmax (no mask)
    m = jnp.max(y, axis=-1, keepdims=True)
    first = jnp.min(jnp.where(y == m, col, y.shape[-1]), axis=-1, keepdims=True)
    y_hard = (col == first).astype(y.dtype)                  # one-hot of argmax
    # TODO(synk): forward-only; wrap (y_hard - y) in stop_gradient if this path
    # is ever differentiated (matches PyTorch's .detach()).
    dis_txt_ref[...] = (y_hard - y) + y


# ---------------------------------------------------------------------------
# Wrapper: host-side layout plumbing (head split, scale folding, lane padding)
# ---------------------------------------------------------------------------
def latent_bert_t_forward(image, text, params, *, num_heads, temp, noise_key):
    B, Nv, D = image.shape
    _, Nt, _ = text.shape
    C = params["wa"].shape[1]
    hd = D // num_heads
    C_pad = ((C + 127) // 128) * 128
    scale = 1.0 / (hd ** 0.5)

    def split_w(w):        # (D, D) -> (H, D, hd): per-head column blocks
        return jnp.transpose(w.reshape(D, num_heads, hd), (1, 0, 2))

    def split_b(b):        # (1, D) -> (H, 1, hd)
        return jnp.transpose(b.reshape(1, num_heads, hd), (1, 0, 2))

    wq_h = split_w(params["wq"] * scale)          # fold 1/sqrt(hd) into Q proj
    bq_h = split_b(params["bq"] * scale)
    wk_h, bk_h = split_w(params["wk"]), split_b(params["bk"])
    wv_h, bv_h = split_w(params["wv"]), split_b(params["bv"])
    wo_h = params["wo"].reshape(num_heads, hd, D)  # per-head row blocks

    def pad_cls(w, b):     # lane-dense classifiers: pad class dim to C_pad
        wp = jnp.pad(w, ((0, 0), (0, C_pad - C)))
        bp = jnp.pad(b, ((0, 0), (0, C_pad - C)), constant_values=-1e30)
        return wp, bp

    wa_p, ba_p = pad_cls(params["wa"], params["ba"])
    wgt_p, bgt_p = pad_cls(params["wgt"], params["bgt"])

    img2 = image.reshape(B * Nv, D)
    txt2 = text.reshape(B * Nt, D)
    text_cls = text[:, 0, :]                                       # text[:, 0, :]
    u = jax.random.uniform(noise_key, (B, C_pad), dtype=jnp.float32)  # uniform_()
    pool = jnp.repeat(jnp.eye(B, dtype=jnp.float32), Nv, axis=1) / Nv  # (B, B*Nv)

    kernel = functools.partial(latent_bert_kernel, 1.0 / temp, C)
    dis_img_p, dis_txt_p = pl.pallas_call(
        kernel,
        out_shape=(jax.ShapeDtypeStruct((B, C_pad), jnp.float32),
                   jax.ShapeDtypeStruct((B, C_pad), jnp.float32)),
    )(img2, txt2, text_cls, u, pool,
      wq_h, bq_h, wk_h, bk_h, wv_h, bv_h, wo_h, params["bo"],
      params["ln1_g"], params["ln1_b"], params["w1"], params["b1"],
      params["w2"], params["b2"], params["ln2_g"], params["ln2_b"],
      wa_p, ba_p, wgt_p, bgt_p)

    return dis_img_p[:, :C], dis_txt_p[:, :C]


if __name__ == "__main__":
    # Small shapes consistent with the module's forward (hidden scaled 768 -> 32,
    # 8 heads -> 4, FFN 512 -> 64, 20 classes).
    B, Nv, Nt, D, HFF, C, HEADS = 2, 16, 8, 32, 64, 20, 4
    TEMP = 0.3

    key = jax.random.PRNGKey(0)
    ks = jax.random.split(key, 16)
    w = lambda k, shape: 0.05 * jax.random.normal(k, shape, jnp.float32)

    params = {
        "wq": w(ks[0], (D, D)), "bq": jnp.zeros((1, D), jnp.float32),
        "wk": w(ks[1], (D, D)), "bk": jnp.zeros((1, D), jnp.float32),
        "wv": w(ks[2], (D, D)), "bv": jnp.zeros((1, D), jnp.float32),
        "wo": w(ks[3], (D, D)), "bo": jnp.zeros((1, D), jnp.float32),
        "ln1_g": jnp.ones((1, D), jnp.float32), "ln1_b": jnp.zeros((1, D), jnp.float32),
        "w1": w(ks[4], (D, HFF)), "b1": jnp.zeros((1, HFF), jnp.float32),
        "w2": w(ks[5], (HFF, D)), "b2": jnp.zeros((1, D), jnp.float32),
        "ln2_g": jnp.ones((1, D), jnp.float32), "ln2_b": jnp.zeros((1, D), jnp.float32),
        "wa": w(ks[6], (D, C)), "ba": jnp.zeros((1, C), jnp.float32),    # fc_a
        "wgt": w(ks[7], (D, C)), "bgt": jnp.zeros((1, C), jnp.float32),  # fc_gt
    }

    image = jax.random.normal(ks[10], (B, Nv, D), jnp.float32)
    text = jax.random.normal(ks[11], (B, Nt, D), jnp.float32)

    dis_image, dis_text = latent_bert_t_forward(
        image, text, params, num_heads=HEADS, temp=TEMP, noise_key=ks[12])
    jax.block_until_ready((dis_image, dis_text))

    assert dis_image.shape == (B, C) and dis_text.shape == (B, C)
    assert bool(jnp.all(jnp.isfinite(dis_image))) and bool(jnp.all(jnp.isfinite(dis_text)))
    # dis_image rows are softmax distributions (approx-reciprocal denominator);
    # dis_text rows are straight-through (one-hot-valued) distributions.
    assert bool(jnp.allclose(jnp.sum(dis_image, axis=1), 1.0, atol=5e-3))
    assert bool(jnp.allclose(jnp.sum(dis_text, axis=1), 1.0, atol=5e-3))
    print("KERNEL_OK")
</pallas_src>

<mosaic_0001>
module attributes {stable_mosaic.version = 11 : i64} {
  func.func @latent_bert_kernel(%arg0: memref<32x32xf32, #tpu.memory_space<vmem>>, %arg1: memref<16x32xf32, #tpu.memory_space<vmem>>, %arg2: memref<2x32xf32, #tpu.memory_space<vmem>>, %arg3: memref<2x128xf32, #tpu.memory_space<vmem>>, %arg4: memref<2x32xf32, #tpu.memory_space<vmem>>, %arg5: memref<4x32x8xf32, #tpu.memory_space<vmem>>, %arg6: memref<4x1x8xf32, #tpu.memory_space<vmem>>, %arg7: memref<4x32x8xf32, #tpu.memory_space<vmem>>, %arg8: memref<4x1x8xf32, #tpu.memory_space<vmem>>, %arg9: memref<4x32x8xf32, #tpu.memory_space<vmem>>, %arg10: memref<4x1x8xf32, #tpu.memory_space<vmem>>, %arg11: memref<4x8x32xf32, #tpu.memory_space<vmem>>, %arg12: memref<1x32xf32, #tpu.memory_space<vmem>>, %arg13: memref<1x32xf32, #tpu.memory_space<vmem>>, %arg14: memref<1x32xf32, #tpu.memory_space<vmem>>, %arg15: memref<32x64xf32, #tpu.memory_space<vmem>>, %arg16: memref<1x64xf32, #tpu.memory_space<vmem>>, %arg17: memref<64x32xf32, #tpu.memory_space<vmem>>, %arg18: memref<1x32xf32, #tpu.memory_space<vmem>>, %arg19: memref<1x32xf32, #tpu.memory_space<vmem>>, %arg20: memref<1x32xf32, #tpu.memory_space<vmem>>, %arg21: memref<32x128xf32, #tpu.memory_space<vmem>>, %arg22: memref<1x128xf32, #tpu.memory_space<vmem>>, %arg23: memref<32x128xf32, #tpu.memory_space<vmem>>, %arg24: memref<1x128xf32, #tpu.memory_space<vmem>>, %arg25: memref<2x128xf32, #tpu.memory_space<vmem>>, %arg26: memref<2x128xf32, #tpu.memory_space<vmem>>) attributes {dimension_semantics = [], scalar_prefetch = 0 : i64, scratch_operands = 0 : i64, tpu.core_type = #tpu.core_type<tc>} {
    %c0 = arith.constant 0 : index
    %c0_0 = arith.constant 0 : index
    %0 = vector.load %arg0[%c0, %c0_0] : memref<32x32xf32, #tpu.memory_space<vmem>>, vector<32x32xf32>
    %c0_1 = arith.constant 0 : index
    %c0_2 = arith.constant 0 : index
    %1 = vector.load %arg1[%c0_1, %c0_2] : memref<16x32xf32, #tpu.memory_space<vmem>>, vector<16x32xf32>
    %c0_3 = arith.constant 0 : index
    %c0_4 = arith.constant 0 : index
    %2 = vector.load %arg12[%c0_3, %c0_4] : memref<1x32xf32, #tpu.memory_space<vmem>>, vector<1x32xf32>
    %3 = vector.broadcast %2 : vector<1x32xf32> to vector<32x32xf32>
    %4 = arith.addf %0, %3 : vector<32x32xf32>
    %c0_5 = arith.constant 0 : index
    %c0_6 = arith.constant 0 : index
    %c0_7 = arith.constant 0 : index
    %5 = vector.load %arg5[%c0_5, %c0_6, %c0_7] : memref<4x32x8xf32, #tpu.memory_space<vmem>>, vector<1x32x8xf32>
    %6 = vector.shape_cast %5 : vector<1x32x8xf32> to vector<32x8xf32>
    %cst = arith.constant dense<0.000000e+00> : vector<32x8xf32>
    %7 = tpu.matmul %0, %6, %cst {dimension_numbers = #tpu.dot_dimension_numbers<[1], [0], [0], [1], [0, 0, 1, 1], [], []>} : vector<32x32xf32>, vector<32x8xf32>, vector<32x8xf32> -> vector<32x8xf32>
    %c0_8 = arith.constant 0 : index
    %c0_9 = arith.constant 0 : index
    %c0_10 = arith.constant 0 : index
    %8 = vector.load %arg6[%c0_8, %c0_9, %c0_10] : memref<4x1x8xf32, #tpu.memory_space<vmem>>, vector<1x1x8xf32>
    %9 = vector.shape_cast %8 : vector<1x1x8xf32> to vector<1x8xf32>
    %10 = vector.broadcast %9 : vector<1x8xf32> to vector<32x8xf32>
    %11 = arith.addf %7, %10 : vector<32x8xf32>
    %12 = vector.shape_cast %11 : vector<32x8xf32> to vector<2x16x8xf32>
    %c0_11 = arith.constant 0 : index
    %c0_12 = arith.constant 0 : index
    %c0_13 = arith.constant 0 : index
    %13 = vector.load %arg7[%c0_11, %c0_12, %c0_13] : memref<4x32x8xf32, #tpu.memory_space<vmem>>, vector<1x32x8xf32>
    %14 = vector.shape_cast %13 : vector<1x32x8xf32> to vector<32x8xf32>
    %cst_14 = arith.constant dense<0.000000e+00> : vector<16x8xf32>
    %15 = tpu.matmul %1, %14, %cst_14 {dimension_numbers = #tpu.dot_dimension_numbers<[1], [0], [0], [1], [0, 0, 1, 1], [], []>} : vector<16x32xf32>, vector<32x8xf32>, vector<16x8xf32> -> vector<16x8xf32>
    %c0_15 = arith.constant 0 : index
    %c0_16 = arith.constant 0 : index
    %c0_17 = arith.constant 0 : index
    %16 = vector.load %arg8[%c0_15, %c0_16, %c0_17] : memref<4x1x8xf32, #tpu.memory_space<vmem>>, vector<1x1x8xf32>
    %17 = vector.shape_cast %16 : vector<1x1x8xf32> to vector<1x8xf32>
    %18 = vector.broadcast %17 : vector<1x8xf32> to vector<16x8xf32>
    %19 = arith.addf %15, %18 : vector<16x8xf32>
    %20 = vector.shape_cast %19 : vector<16x8xf32> to vector<2x8x8xf32>
    %c0_18 = arith.constant 0 : index
    %c0_19 = arith.constant 0 : index
    %c0_20 = arith.constant 0 : index
    %21 = vector.load %arg9[%c0_18, %c0_19, %c0_20] : memref<4x32x8xf32, #tpu.memory_space<vmem>>, vector<1x32x8xf32>
    %22 = vector.shape_cast %21 : vector<1x32x8xf32> to vector<32x8xf32>
    %cst_21 = arith.constant dense<0.000000e+00> : vector<16x8xf32>
    %23 = tpu.matmul %1, %22, %cst_21 {dimension_numbers = #tpu.dot_dimension_numbers<[1], [0], [0], [1], [0, 0, 1, 1], [], []>} : vector<16x32xf32>, vector<32x8xf32>, vector<16x8xf32> -> vector<16x8xf32>
    %c0_22 = arith.constant 0 : index
    %c0_23 = arith.constant 0 : index
    %c0_24 = arith.constant 0 : index
    %24 = vector.load %arg10[%c0_22, %c0_23, %c0_24] : memref<4x1x8xf32, #tpu.memory_space<vmem>>, vector<1x1x8xf32>
    %25 = vector.shape_cast %24 : vector<1x1x8xf32> to vector<1x8xf32>
    %26 = vector.broadcast %25 : vector<1x8xf32> to vector<16x8xf32>
    %27 = arith.addf %23, %26 : vector<16x8xf32>
    %28 = vector.shape_cast %27 : vector<16x8xf32> to vector<2x8x8xf32>
    "tpu.trace_start"() <{level = 10 : i32, message = "bqe,bke->bqk"}> : () -> ()
    %cst_25 = arith.constant dense<0.000000e+00> : vector<2x16x8xf32>
    %29 = tpu.matmul %12, %20, %cst_25 {dimension_numbers = #tpu.dot_dimension_numbers<[2], [2], [1], [1], [0, 0, 0, 1, 1, 1], [0], [0]>} : vector<2x16x8xf32>, vector<2x8x8xf32>, vector<2x16x8xf32> -> vector<2x16x8xf32>
    "tpu.trace_stop"() : () -> ()
    %cst_26 = arith.constant dense<0xFF800000> : vector<2x16xf32>
    %30 = vector.multi_reduction <maximumf>, %29, %cst_26 [2] : vector<2x16x8xf32> to vector<2x16xf32>
    %31 = vector.shape_cast %30 : vector<2x16xf32> to vector<2x16x1xf32>
    %32 = vector.broadcast %31 : vector<2x16x1xf32> to vector<2x16x8xf32>
    %33 = arith.subf %29, %32 : vector<2x16x8xf32>
    %34 = math.exp %33 : vector<2x16x8xf32>
    %cst_27 = arith.constant dense<0.000000e+00> : vector<2x16xf32>
    %35 = vector.multi_reduction <add>, %34, %cst_27 [2] : vector<2x16x8xf32> to vector<2x16xf32>
    %36 = vector.shape_cast %35 : vector<2x16xf32> to vector<2x16x1xf32>
    %37 = tpu.reciprocal %36 {approx = true} : vector<2x16x1xf32> -> vector<2x16x1xf32>
    %38 = vector.broadcast %37 : vector<2x16x1xf32> to vector<2x16x8xf32>
    %39 = arith.mulf %34, %38 : vector<2x16x8xf32>
    "tpu.trace_start"() <{level = 10 : i32, message = "bqk,bke->bqe"}> : () -> ()
    %cst_28 = arith.constant dense<0.000000e+00> : vector<2x16x8xf32>
    %40 = tpu.matmul %39, %28, %cst_28 {dimension_numbers = #tpu.dot_dimension_numbers<[2], [1], [1], [2], [0, 0, 0, 1, 1, 2], [0], [0]>} : vector<2x16x8xf32>, vector<2x8x8xf32>, vector<2x16x8xf32> -> vector<2x16x8xf32>
    "tpu.trace_stop"() : () -> ()
    %41 = vector.shape_cast %40 : vector<2x16x8xf32> to vector<32x8xf32>
    %c0_29 = arith.constant 0 : index
    %c0_30 = arith.constant 0 : index
    %c0_31 = arith.constant 0 : index
    %42 = vector.load %arg11[%c0_29, %c0_30, %c0_31] : memref<4x8x32xf32, #tpu.memory_space<vmem>>, vector<1x8x32xf32>
    %43 = vector.shape_cast %42 : vector<1x8x32xf32> to vector<8x32xf32>
    %cst_32 = arith.constant dense<0.000000e+00> : vector<32x32xf32>
    %44 = tpu.matmul %41, %43, %cst_32 {dimension_numbers = #tpu.dot_dimension_numbers<[1], [0], [0], [1], [0, 0, 1, 1], [], []>} : vector<32x8xf32>, vector<8x32xf32>, vector<32x32xf32> -> vector<32x32xf32>
    %45 = arith.addf %4, %44 : vector<32x32xf32>
    %c1 = arith.constant 1 : index
    %c0_33 = arith.constant 0 : index
    %c0_34 = arith.constant 0 : index
    %46 = vector.load %arg5[%c1, %c0_33, %c0_34] : memref<4x32x8xf32, #tpu.memory_space<vmem>>, vector<1x32x8xf32>
    %47 = vector.shape_cast %46 : vector<1x32x8xf32> to vector<32x8xf32>
    %cst_35 = arith.constant dense<0.000000e+00> : vector<32x8xf32>
    %48 = tpu.matmul %0, %47, %cst_35 {dimension_numbers = #tpu.dot_dimension_numbers<[1], [0], [0], [1], [0, 0, 1, 1], [], []>} : vector<32x32xf32>, vector<32x8xf32>, vector<32x8xf32> -> vector<32x8xf32>
    %c1_36 = arith.constant 1 : index
    %c0_37 = arith.constant 0 : index
    %c0_38 = arith.constant 0 : index
    %49 = vector.load %arg6[%c1_36, %c0_37, %c0_38] : memref<4x1x8xf32, #tpu.memory_space<vmem>>, vector<1x1x8xf32>
    %50 = vector.shape_cast %49 : vector<1x1x8xf32> to vector<1x8xf32>
    %51 = vector.broadcast %50 : vector<1x8xf32> to vector<32x8xf32>
    %52 = arith.addf %48, %51 : vector<32x8xf32>
    %53 = vector.shape_cast %52 : vector<32x8xf32> to vector<2x16x8xf32>
    %c1_39 = arith.constant 1 : index
    %c0_40 = arith.constant 0 : index
    %c0_41 = arith.constant 0 : index
    %54 = vector.load %arg7[%c1_39, %c0_40, %c0_41] : memref<4x32x8xf32, #tpu.memory_space<vmem>>, vector<1x32x8xf32>
    %55 = vector.shape_cast %54 : vector<1x32x8xf32> to vector<32x8xf32>
    %cst_42 = arith.constant dense<0.000000e+00> : vector<16x8xf32>
    %56 = tpu.matmul %1, %55, %cst_42 {dimension_numbers = #tpu.dot_dimension_numbers<[1], [0], [0], [1], [0, 0, 1, 1], [], []>} : vector<16x32xf32>, vector<32x8xf32>, vector<16x8xf32> -> vector<16x8xf32>
    %c1_43 = arith.constant 1 : index
    %c0_44 = arith.constant 0 : index
    %c0_45 = arith.constant 0 : index
    %57 = vector.load %arg8[%c1_43, %c0_44, %c0_45] : memref<4x1x8xf32, #tpu.memory_space<vmem>>, vector<1x1x8xf32>
    %58 = vector.shape_cast %57 : vector<1x1x8xf32> to vector<1x8xf32>
    %59 = vector.broadcast %58 : vector<1x8xf32> to vector<16x8xf32>
    %60 = arith.addf %56, %59 : vector<16x8xf32>
    %61 = vector.shape_cast %60 : vector<16x8xf32> to vector<2x8x8xf32>
    %c1_46 = arith.constant 1 : index
    %c0_47 = arith.constant 0 : index
    %c0_48 = arith.constant 0 : index
    %62 = vector.load %arg9[%c1_46, %c0_47, %c0_48] : memref<4x32x8xf32, #tpu.memory_space<vmem>>, vector<1x32x8xf32>
    %63 = vector.shape_cast %62 : vector<1x32x8xf32> to vector<32x8xf32>
    %cst_49 = arith.constant dense<0.000000e+00> : vector<16x8xf32>
    %64 = tpu.matmul %1, %63, %cst_49 {dimension_numbers = #tpu.dot_dimension_numbers<[1], [0], [0], [1], [0, 0, 1, 1], [], []>} : vector<16x32xf32>, vector<32x8xf32>, vector<16x8xf32> -> vector<16x8xf32>
    %c1_50 = arith.constant 1 : index
    %c0_51 = arith.constant 0 : index
    %c0_52 = arith.constant 0 : index
    %65 = vector.load %arg10[%c1_50, %c0_51, %c0_52] : memref<4x1x8xf32, #tpu.memory_space<vmem>>, vector<1x1x8xf32>
    %66 = vector.shape_cast %65 : vector<1x1x8xf32> to vector<1x8xf32>
    %67 = vector.broadcast %66 : vector<1x8xf32> to vector<16x8xf32>
    %68 = arith.addf %64, %67 : vector<16x8xf32>
    %69 = vector.shape_cast %68 : vector<16x8xf32> to vector<2x8x8xf32>
    "tpu.trace_start"() <{level = 10 : i32, message = "bqe,bke->bqk"}> : () -> ()
    %cst_53 = arith.constant dense<0.000000e+00> : vector<2x16x8xf32>
    %70 = tpu.matmul %53, %61, %cst_53 {dimension_numbers = #tpu.dot_dimension_numbers<[2], [2], [1], [1], [0, 0, 0, 1, 1, 1], [0], [0]>} : vector<2x16x8xf32>, vector<2x8x8xf32>, vector<2x16x8xf32> -> vector<2x16x8xf32>
    "tpu.trace_stop"() : () -> ()
    %cst_54 = arith.constant dense<0xFF800000> : vector<2x16xf32>
    %71 = vector.multi_reduction <maximumf>, %70, %cst_54 [2] : vector<2x16x8xf32> to vector<2x16xf32>
    %72 = vector.shape_cast %71 : vector<2x16xf32> to vector<2x16x1xf32>
    %73 = vector.broadcast %72 : vector<2x16x1xf32> to vector<2x16x8xf32>
    %74 = arith.subf %70, %73 : vector<2x16x8xf32>
    %75 = math.exp %74 : vector<2x16x8xf32>
    %cst_55 = arith.constant dense<0.000000e+00> : vector<2x16xf32>
    %76 = vector.multi_reduction <add>, %75, %cst_55 [2] : vector<2x16x8xf32> to vector<2x16xf32>
    %77 = vector.shape_cast %76 : vector<2x16xf32> to vector<2x16x1xf32>
    %78 = tpu.reciprocal %77 {approx = true} : vector<2x16x1xf32> -> vector<2x16x1xf32>
    %79 = vector.broadcast %78 : vector<2x16x1xf32> to vector<2x16x8xf32>
    %80 = arith.mulf %75, %79 : vector<2x16x8xf32>
    "tpu.trace_start"() <{level = 10 : i32, message = "bqk,bke->bqe"}> : () -> ()
    %cst_56 = arith.constant dense<0.000000e+00> : vector<2x16x8xf32>
    %81 = tpu.matmul %80, %69, %cst_56 {dimension_numbers = #tpu.dot_dimension_numbers<[2], [1], [1], [2], [0, 0, 0, 1, 1, 2], [0], [0]>} : vector<2x16x8xf32>, vector<2x8x8xf32>, vector<2x16x8xf32> -> vector<2x16x8xf32>
    "tpu.trace_stop"() : () -> ()
    %82 = vector.shape_cast %81 : vector<2x16x8xf32> to vector<32x8xf32>
    %c1_57 = arith.constant 1 : index
    %c0_58 = arith.constant 0 : index
    %c0_59 = arith.constant 0 : index
    %83 = vector.load %arg11[%c1_57, %c0_58, %c0_59] : memref<4x8x32xf32, #tpu.memory_space<vmem>>, vector<1x8x32xf32>
    %84 = vector.shape_cast %83 : vector<1x8x32xf32> to vector<8x32xf32>
    %cst_60 = arith.constant dense<0.000000e+00> : vector<32x32xf32>
    %85 = tpu.matmul %82, %84, %cst_60 {dimension_numbers = #tpu.dot_dimension_numbers<[1], [0], [0], [1], [0, 0, 1, 1], [], []>} : vector<32x8xf32>, vector<8x32xf32>, vector<32x32xf32> -> vector<32x32xf32>
    %86 = arith.addf %45, %85 : vector<32x32xf32>
    %c2 = arith.constant 2 : index
    %c0_61 = arith.constant 0 : index
    %c0_62 = arith.constant 0 : index
    %87 = vector.load %arg5[%c2, %c0_61, %c0_62] : memref<4x32x8xf32, #tpu.memory_space<vmem>>, vector<1x32x8xf32>
    %88 = vector.shape_cast %87 : vector<1x32x8xf32> to vector<32x8xf32>
    %cst_63 = arith.constant dense<0.000000e+00> : vector<32x8xf32>
    %89 = tpu.matmul %0, %88, %cst_63 {dimension_numbers = #tpu.dot_dimension_numbers<[1], [0], [0], [1], [0, 0, 1, 1], [], []>} : vector<32x32xf32>, vector<32x8xf32>, vector<32x8xf32> -> vector<32x8xf32>
    %c2_64 = arith.constant 2 : index
    %c0_65 = arith.constant 0 : index
    %c0_66 = arith.constant 0 : index
    %90 = vector.load %arg6[%c2_64, %c0_65, %c0_66] : memref<4x1x8xf32, #tpu.memory_space<vmem>>, vector<1x1x8xf32>
    %91 = vector.shape_cast %90 : vector<1x1x8xf32> to vector<1x8xf32>
    %92 = vector.broadcast %91 : vector<1x8xf32> to vector<32x8xf32>
    %93 = arith.addf %89, %92 : vector<32x8xf32>
    %94 = vector.shape_cast %93 : vector<32x8xf32> to vector<2x16x8xf32>
    %c2_67 = arith.constant 2 : index
    %c0_68 = arith.constant 0 : index
    %c0_69 = arith.constant 0 : index
    %95 = vector.load %arg7[%c2_67, %c0_68, %c0_69] : memref<4x32x8xf32, #tpu.memory_space<vmem>>, vector<1x32x8xf32>
    %96 = vector.shape_cast %95 : vector<1x32x8xf32> to vector<32x8xf32>
    %cst_70 = arith.constant dense<0.000000e+00> : vector<16x8xf32>
    %97 = tpu.matmul %1, %96, %cst_70 {dimension_numbers = #tpu.dot_dimension_numbers<[1], [0], [0], [1], [0, 0, 1, 1], [], []>} : vector<16x32xf32>, vector<32x8xf32>, vector<16x8xf32> -> vector<16x8xf32>
    %c2_71 = arith.constant 2 : index
    %c0_72 = arith.constant 0 : index
    %c0_73 = arith.constant 0 : index
    %98 = vector.load %arg8[%c2_71, %c0_72, %c0_73] : memref<4x1x8xf32, #tpu.memory_space<vmem>>, vector<1x1x8xf32>
    %99 = vector.shape_cast %98 : vector<1x1x8xf32> to vector<1x8xf32>
    %100 = vector.broadcast %99 : vector<1x8xf32> to vector<16x8xf32>
    %101 = arith.addf %97, %100 : vector<16x8xf32>
    %102 = vector.shape_cast %101 : vector<16x8xf32> to vector<2x8x8xf32>
    %c2_74 = arith.constant 2 : index
    %c0_75 = arith.constant 0 : index
    %c0_76 = arith.constant 0 : index
    %103 = vector.load %arg9[%c2_74, %c0_75, %c0_76] : memref<4x32x8xf32, #tpu.memory_space<vmem>>, vector<1x32x8xf32>
    %104 = vector.shape_cast %103 : vector<1x32x8xf32> to vector<32x8xf32>
    %cst_77 = arith.constant dense<0.000000e+00> : vector<16x8xf32>
    %105 = tpu.matmul %1, %104, %cst_77 {dimension_numbers = #tpu.dot_dimension_numbers<[1], [0], [0], [1], [0, 0, 1, 1], [], []>} : vector<16x32xf32>, vector<32x8xf32>, vector<16x8xf32> -> vector<16x8xf32>
    %c2_78 = arith.constant 2 : index
    %c0_79 = arith.constant 0 : index
    %c0_80 = arith.constant 0 : index
    %106 = vector.load %arg10[%c2_78, %c0_79, %c0_80] : memref<4x1x8xf32, #tpu.memory_space<vmem>>, vector<1x1x8xf32>
    %107 = vector.shape_cast %106 : vector<1x1x8xf32> to vector<1x8xf32>
    %108 = vector.broadcast %107 : vector<1x8xf32> to vector<16x8xf32>
    %109 = arith.addf %105, %108 : vector<16x8xf32>
    %110 = vector.shape_cast %109 : vector<16x8xf32> to vector<2x8x8xf32>
    "tpu.trace_start"() <{level = 10 : i32, message = "bqe,bke->bqk"}> : () -> ()
    %cst_81 = arith.constant dense<0.000000e+00> : vector<2x16x8xf32>
    %111 = tpu.matmul %94, %102, %cst_81 {dimension_numbers = #tpu.dot_dimension_numbers<[2], [2], [1], [1], [0, 0, 0, 1, 1, 1], [0], [0]>} : vector<2x16x8xf32>, vector<2x8x8xf32>, vector<2x16x8xf32> -> vector<2x16x8xf32>
    "tpu.trace_stop"() : () -> ()
    %cst_82 = arith.constant dense<0xFF800000> : vector<2x16xf32>
    %112 = vector.multi_reduction <maximumf>, %111, %cst_82 [2] : vector<2x16x8xf32> to vector<2x16xf32>
    %113 = vector.shape_cast %112 : vector<2x16xf32> to vector<2x16x1xf32>
    %114 = vector.broadcast %113 : vector<2x16x1xf32> to vector<2x16x8xf32>
    %115 = arith.subf %111, %114 : vector<2x16x8xf32>
    %116 = math.exp %115 : vector<2x16x8xf32>
    %cst_83 = arith.constant dense<0.000000e+00> : vector<2x16xf32>
    %117 = vector.multi_reduction <add>, %116, %cst_83 [2] : vector<2x16x8xf32> to vector<2x16xf32>
    %118 = vector.shape_cast %117 : vector<2x16xf32> to vector<2x16x1xf32>
    %119 = tpu.reciprocal %118 {approx = true} : vector<2x16x1xf32> -> vector<2x16x1xf32>
    %120 = vector.broadcast %119 : vector<2x16x1xf32> to vector<2x16x8xf32>
    %121 = arith.mulf %116, %120 : vector<2x16x8xf32>
    "tpu.trace_start"() <{level = 10 : i32, message = "bqk,bke->bqe"}> : () -> ()
    %cst_84 = arith.constant dense<0.000000e+00> : vector<2x16x8xf32>
    %122 = tpu.matmul %121, %110, %cst_84 {dimension_numbers = #tpu.dot_dimension_numbers<[2], [1], [1], [2], [0, 0, 0, 1, 1, 2], [0], [0]>} : vector<2x16x8xf32>, vector<2x8x8xf32>, vector<2x16x8xf32> -> vector<2x16x8xf32>
    "tpu.trace_stop"() : () -> ()
    %123 = vector.shape_cast %122 : vector<2x16x8xf32> to vector<32x8xf32>
    %c2_85 = arith.constant 2 : index
    %c0_86 = arith.constant 0 : index
    %c0_87 = arith.constant 0 : index
    %124 = vector.load %arg11[%c2_85, %c0_86, %c0_87] : memref<4x8x32xf32, #tpu.memory_space<vmem>>, vector<1x8x32xf32>
    %125 = vector.shape_cast %124 : vector<1x8x32xf32> to vector<8x32xf32>
    %cst_88 = arith.constant dense<0.000000e+00> : vector<32x32xf32>
    %126 = tpu.matmul %123, %125, %cst_88 {dimension_numbers = #tpu.dot_dimension_numbers<[1], [0], [0], [1], [0, 0, 1, 1], [], []>} : vector<32x8xf32>, vector<8x32xf32>, vector<32x32xf32> -> vector<32x32xf32>
    %127 = arith.addf %86, %126 : vector<32x32xf32>
    %c3 = arith.constant 3 : index
    %c0_89 = arith.constant 0 : index
    %c0_90 = arith.constant 0 : index
    %128 = vector.load %arg5[%c3, %c0_89, %c0_90] : memref<4x32x8xf32, #tpu.memory_space<vmem>>, vector<1x32x8xf32>
    %129 = vector.shape_cast %128 : vector<1x32x8xf32> to vector<32x8xf32>
    %cst_91 = arith.constant dense<0.000000e+00> : vector<32x8xf32>
    %130 = tpu.matmul %0, %129, %cst_91 {dimension_numbers = #tpu.dot_dimension_numbers<[1], [0], [0], [1], [0, 0, 1, 1], [], []>} : vector<32x32xf32>, vector<32x8xf32>, vector<32x8xf32> -> vector<32x8xf32>
    %c3_92 = arith.constant 3 : index
    %c0_93 = arith.constant 0 : index
    %c0_94 = arith.constant 0 : index
    %131 = vector.load %arg6[%c3_92, %c0_93, %c0_94] : memref<4x1x8xf32, #tpu.memory_space<vmem>>, vector<1x1x8xf32>
    %132 = vector.shape_cast %131 : vector<1x1x8xf32> to vector<1x8xf32>
    %133 = vector.broadcast %132 : vector<1x8xf32> to vector<32x8xf32>
    %134 = arith.addf %130, %133 : vector<32x8xf32>
    %135 = vector.shape_cast %134 : vector<32x8xf32> to vector<2x16x8xf32>
    %c3_95 = arith.constant 3 : index
    %c0_96 = arith.constant 0 : index
    %c0_97 = arith.constant 0 : index
    %136 = vector.load %arg7[%c3_95, %c0_96, %c0_97] : memref<4x32x8xf32, #tpu.memory_space<vmem>>, vector<1x32x8xf32>
    %137 = vector.shape_cast %136 : vector<1x32x8xf32> to vector<32x8xf32>
    %cst_98 = arith.constant dense<0.000000e+00> : vector<16x8xf32>
    %138 = tpu.matmul %1, %137, %cst_98 {dimension_numbers = #tpu.dot_dimension_numbers<[1], [0], [0], [1], [0, 0, 1, 1], [], []>} : vector<16x32xf32>, vector<32x8xf32>, vector<16x8xf32> -> vector<16x8xf32>
    %c3_99 = arith.constant 3 : index
    %c0_100 = arith.constant 0 : index
    %c0_101 = arith.constant 0 : index
    %139 = vector.load %arg8[%c3_99, %c0_100, %c0_101] : memref<4x1x8xf32, #tpu.memory_space<vmem>>, vector<1x1x8xf32>
    %140 = vector.shape_cast %139 : vector<1x1x8xf32> to vector<1x8xf32>
    %141 = vector.broadcast %140 : vector<1x8xf32> to vector<16x8xf32>
    %142 = arith.addf %138, %141 : vector<16x8xf32>
    %143 = vector.shape_cast %142 : vector<16x8xf32> to vector<2x8x8xf32>
    %c3_102 = arith.constant 3 : index
    %c0_103 = arith.constant 0 : index
    %c0_104 = arith.constant 0 : index
    %144 = vector.load %arg9[%c3_102, %c0_103, %c0_104] : memref<4x32x8xf32, #tpu.memory_space<vmem>>, vector<1x32x8xf32>
    %145 = vector.shape_cast %144 : vector<1x32x8xf32> to vector<32x8xf32>
    %cst_105 = arith.constant dense<0.000000e+00> : vector<16x8xf32>
    %146 = tpu.matmul %1, %145, %cst_105 {dimension_numbers = #tpu.dot_dimension_numbers<[1], [0], [0], [1], [0, 0, 1, 1], [], []>} : vector<16x32xf32>, vector<32x8xf32>, vector<16x8xf32> -> vector<16x8xf32>
    %c3_106 = arith.constant 3 : index
    %c0_107 = arith.constant 0 : index
    %c0_108 = arith.constant 0 : index
    %147 = vector.load %arg10[%c3_106, %c0_107, %c0_108] : memref<4x1x8xf32, #tpu.memory_space<vmem>>, vector<1x1x8xf32>
    %148 = vector.shape_cast %147 : vector<1x1x8xf32> to vector<1x8xf32>
    %149 = vector.broadcast %148 : vector<1x8xf32> to vector<16x8xf32>
    %150 = arith.addf %146, %149 : vector<16x8xf32>
    %151 = vector.shape_cast %150 : vector<16x8xf32> to vector<2x8x8xf32>
    "tpu.trace_start"() <{level = 10 : i32, message = "bqe,bke->bqk"}> : () -> ()
    %cst_109 = arith.constant dense<0.000000e+00> : vector<2x16x8xf32>
    %152 = tpu.matmul %135, %143, %cst_109 {dimension_numbers = #tpu.dot_dimension_numbers<[2], [2], [1], [1], [0, 0, 0, 1, 1, 1], [0], [0]>} : vector<2x16x8xf32>, vector<2x8x8xf32>, vector<2x16x8xf32> -> vector<2x16x8xf32>
    "tpu.trace_stop"() : () -> ()
    %cst_110 = arith.constant dense<0xFF800000> : vector<2x16xf32>
    %153 = vector.multi_reduction <maximumf>, %152, %cst_110 [2] : vector<2x16x8xf32> to vector<2x16xf32>
    %154 = vector.shape_cast %153 : vector<2x16xf32> to vector<2x16x1xf32>
    %155 = vector.broadcast %154 : vector<2x16x1xf32> to vector<2x16x8xf32>
    %156 = arith.subf %152, %155 : vector<2x16x8xf32>
    %157 = math.exp %156 : vector<2x16x8xf32>
    %cst_111 = arith.constant dense<0.000000e+00> : vector<2x16xf32>
    %158 = vector.multi_reduction <add>, %157, %cst_111 [2] : vector<2x16x8xf32> to vector<2x16xf32>
    %159 = vector.shape_cast %158 : vector<2x16xf32> to vector<2x16x1xf32>
    %160 = tpu.reciprocal %159 {approx = true} : vector<2x16x1xf32> -> vector<2x16x1xf32>
    %161 = vector.broadcast %160 : vector<2x16x1xf32> to vector<2x16x8xf32>
    %162 = arith.mulf %157, %161 : vector<2x16x8xf32>
    "tpu.trace_start"() <{level = 10 : i32, message = "bqk,bke->bqe"}> : () -> ()
    %cst_112 = arith.constant dense<0.000000e+00> : vector<2x16x8xf32>
    %163 = tpu.matmul %162, %151, %cst_112 {dimension_numbers = #tpu.dot_dimension_numbers<[2], [1], [1], [2], [0, 0, 0, 1, 1, 2], [0], [0]>} : vector<2x16x8xf32>, vector<2x8x8xf32>, vector<2x16x8xf32> -> vector<2x16x8xf32>
    "tpu.trace_stop"() : () -> ()
    %164 = vector.shape_cast %163 : vector<2x16x8xf32> to vector<32x8xf32>
    %c3_113 = arith.constant 3 : index
    %c0_114 = arith.constant 0 : index
    %c0_115 = arith.constant 0 : index
    %165 = vector.load %arg11[%c3_113, %c0_114, %c0_115] : memref<4x8x32xf32, #tpu.memory_space<vmem>>, vector<1x8x32xf32>
    %166 = vector.shape_cast %165 : vector<1x8x32xf32> to vector<8x32xf32>
    %cst_116 = arith.constant dense<0.000000e+00> : vector<32x32xf32>
    %167 = tpu.matmul %164, %166, %cst_116 {dimension_numbers = #tpu.dot_dimension_numbers<[1], [0], [0], [1], [0, 0, 1, 1], [], []>} : vector<32x8xf32>, vector<8x32xf32>, vector<32x32xf32> -> vector<32x32xf32>
    %168 = arith.addf %127, %167 : vector<32x32xf32>
    %c0_117 = arith.constant 0 : index
    %c0_118 = arith.constant 0 : index
    %169 = vector.load %arg13[%c0_117, %c0_118] : memref<1x32xf32, #tpu.memory_space<vmem>>, vector<1x32xf32>
    %c0_119 = arith.constant 0 : index
    %c0_120 = arith.constant 0 : index
    %170 = vector.load %arg14[%c0_119, %c0_120] : memref<1x32xf32, #tpu.memory_space<vmem>>, vector<1x32xf32>
    %cst_121 = arith.constant dense<0.000000e+00> : vector<32xf32>
    %171 = vector.multi_reduction <add>, %168, %cst_121 [1] : vector<32x32xf32> to vector<32xf32>
    %172 = vector.shape_cast %171 : vector<32xf32> to vector<32x1xf32>
    %cst_122 = arith.constant 3.200000e+01 : f32
    %173 = vector.broadcast %cst_122 : f32 to vector<32x1xf32>
    %174 = arith.divf %172, %173 : vector<32x1xf32>
    %175 = vector.broadcast %174 : vector<32x1xf32> to vector<32x32xf32>
    %176 = arith.subf %168, %175 : vector<32x32xf32>
    %177 = arith.mulf %176, %176 : vector<32x32xf32>
    %cst_123 = arith.constant dense<0.000000e+00> : vector<32xf32>
    %178 = vector.multi_reduction <add>, %177, %cst_123 [1] : vector<32x32xf32> to vector<32xf32>
    %179 = vector.shape_cast %178 : vector<32xf32> to vector<32x1xf32>
    %cst_124 = arith.constant 3.200000e+01 : f32
    %180 = vector.broadcast %cst_124 : f32 to vector<32x1xf32>
    %181 = arith.divf %179, %180 : vector<32x1xf32>
    %cst_125 = arith.constant 9.99999974E-6 : f32
    %182 = vector.broadcast %cst_125 : f32 to vector<32x1xf32>
    %183 = arith.addf %181, %182 : vector<32x1xf32>
    %184 = math.rsqrt %183 : vector<32x1xf32>
    %185 = vector.broadcast %184 : vector<32x1xf32> to vector<32x32xf32>
    %186 = arith.mulf %176, %185 : vector<32x32xf32>
    %187 = vector.broadcast %169 : vector<1x32xf32> to vector<32x32xf32>
    %188 = arith.mulf %186, %187 : vector<32x32xf32>
    %189 = vector.broadcast %170 : vector<1x32xf32> to vector<32x32xf32>
    %190 = arith.addf %188, %189 : vector<32x32xf32>
    %c0_126 = arith.constant 0 : index
    %c0_127 = arith.constant 0 : index
    %191 = vector.load %arg15[%c0_126, %c0_127] : memref<32x64xf32, #tpu.memory_space<vmem>>, vector<32x64xf32>
    %cst_128 = arith.constant dense<0.000000e+00> : vector<32x64xf32>
    %192 = tpu.matmul %190, %191, %cst_128 {dimension_numbers = #tpu.dot_dimension_numbers<[1], [0], [0], [1], [0, 0, 1, 1], [], []>} : vector<32x32xf32>, vector<32x64xf32>, vector<32x64xf32> -> vector<32x64xf32>
    %c0_129 = arith.constant 0 : index
    %c0_130 = arith.constant 0 : index
    %193 = vector.load %arg16[%c0_129, %c0_130] : memref<1x64xf32, #tpu.memory_space<vmem>>, vector<1x64xf32>
    %194 = vector.broadcast %193 : vector<1x64xf32> to vector<32x64xf32>
    %195 = arith.addf %192, %194 : vector<32x64xf32>
    %cst_131 = arith.constant 0.000000e+00 : f32
    %196 = vector.broadcast %cst_131 : f32 to vector<32x64xf32>
    %197 = arith.maximumf %195, %196 : vector<32x64xf32>
    %c0_132 = arith.constant 0 : index
    %c0_133 = arith.constant 0 : index
    %198 = vector.load %arg17[%c0_132, %c0_133] : memref<64x32xf32, #tpu.memory_space<vmem>>, vector<64x32xf32>
    %cst_134 = arith.constant dense<0.000000e+00> : vector<32x32xf32>
    %199 = tpu.matmul %197, %198, %cst_134 {dimension_numbers = #tpu.dot_dimension_numbers<[1], [0], [0], [1], [0, 0, 1, 1], [], []>} : vector<32x64xf32>, vector<64x32xf32>, vector<32x32xf32> -> vector<32x32xf32>
    %c0_135 = arith.constant 0 : index
    %c0_136 = arith.constant 0 : index
    %200 = vector.load %arg18[%c0_135, %c0_136] : memref<1x32xf32, #tpu.memory_space<vmem>>, vector<1x32xf32>
    %201 = vector.broadcast %200 : vector<1x32xf32> to vector<32x32xf32>
    %202 = arith.addf %199, %201 : vector<32x32xf32>
    %203 = arith.addf %190, %202 : vector<32x32xf32>
    %c0_137 = arith.constant 0 : index
    %c0_138 = arith.constant 0 : index
    %204 = vector.load %arg19[%c0_137, %c0_138] : memref<1x32xf32, #tpu.memory_space<vmem>>, vector<1x32xf32>
    %c0_139 = arith.constant 0 : index
    %c0_140 = arith.constant 0 : index
    %205 = vector.load %arg20[%c0_139, %c0_140] : memref<1x32xf32, #tpu.memory_space<vmem>>, vector<1x32xf32>
    %cst_141 = arith.constant dense<0.000000e+00> : vector<32xf32>
    %206 = vector.multi_reduction <add>, %203, %cst_141 [1] : vector<32x32xf32> to vector<32xf32>
    %207 = vector.shape_cast %206 : vector<32xf32> to vector<32x1xf32>
    %cst_142 = arith.constant 3.200000e+01 : f32
    %208 = vector.broadcast %cst_142 : f32 to vector<32x1xf32>
    %209 = arith.divf %207, %208 : vector<32x1xf32>
    %210 = vector.broadcast %209 : vector<32x1xf32> to vector<32x32xf32>
    %211 = arith.subf %203, %210 : vector<32x32xf32>
    %212 = arith.mulf %211, %211 : vector<32x32xf32>
    %cst_143 = arith.constant dense<0.000000e+00> : vector<32xf32>
    %213 = vector.multi_reduction <add>, %212, %cst_143 [1] : vector<32x32xf32> to vector<32xf32>
    %214 = vector.shape_cast %213 : vector<32xf32> to vector<32x1xf32>
    %cst_144 = arith.constant 3.200000e+01 : f32
    %215 = vector.broadcast %cst_144 : f32 to vector<32x1xf32>
    %216 = arith.divf %214, %215 : vector<32x1xf32>
    %cst_145 = arith.constant 9.99999974E-6 : f32
    %217 = vector.broadcast %cst_145 : f32 to vector<32x1xf32>
    %218 = arith.addf %216, %217 : vector<32x1xf32>
    %219 = math.rsqrt %218 : vector<32x1xf32>
    %220 = vector.broadcast %219 : vector<32x1xf32> to vector<32x32xf32>
    %221 = arith.mulf %211, %220 : vector<32x32xf32>
    %222 = vector.broadcast %204 : vector<1x32xf32> to vector<32x32xf32>
    %223 = arith.mulf %221, %222 : vector<32x32xf32>
    %224 = vector.broadcast %205 : vector<1x32xf32> to vector<32x32xf32>
    %225 = arith.addf %223, %224 : vector<32x32xf32>
    %c0_146 = arith.constant 0 : index
    %c0_147 = arith.constant 0 : index
    %226 = vector.load %arg4[%c0_146, %c0_147] : memref<2x32xf32, #tpu.memory_space<vmem>>, vector<2x32xf32>
    %cst_148 = arith.constant dense<0.000000e+00> : vector<2x32xf32>
    %227 = tpu.matmul %226, %225, %cst_148 {dimension_numbers = #tpu.dot_dimension_numbers<[1], [0], [0], [1], [0, 0, 1, 1], [], []>} : vector<2x32xf32>, vector<32x32xf32>, vector<2x32xf32> -> vector<2x32xf32>
    %c0_149 = arith.constant 0 : index
    %c0_150 = arith.constant 0 : index
    %228 = vector.load %arg21[%c0_149, %c0_150] : memref<32x128xf32, #tpu.memory_space<vmem>>, vector<32x128xf32>
    %cst_151 = arith.constant dense<0.000000e+00> : vector<2x128xf32>
    %229 = tpu.matmul %227, %228, %cst_151 {dimension_numbers = #tpu.dot_dimension_numbers<[1], [0], [0], [1], [0, 0, 1, 1], [], []>} : vector<2x32xf32>, vector<32x128xf32>, vector<2x128xf32> -> vector<2x128xf32>
    %c0_152 = arith.constant 0 : index
    %c0_153 = arith.constant 0 : index
    %230 = vector.load %arg22[%c0_152, %c0_153] : memref<1x128xf32, #tpu.memory_space<vmem>>, vector<1x128xf32>
    %231 = vector.broadcast %230 : vector<1x128xf32> to vector<2x128xf32>
    %232 = arith.addf %229, %231 : vector<2x128xf32>
    %cst_154 = arith.constant dense<0xFF800000> : vector<2xf32>
    %233 = vector.multi_reduction <maximumf>, %232, %cst_154 [1] : vector<2x128xf32> to vector<2xf32>
    %234 = vector.shape_cast %233 : vector<2xf32> to vector<2x1xf32>
    %235 = vector.broadcast %234 : vector<2x1xf32> to vector<2x128xf32>
    %236 = arith.subf %232, %235 : vector<2x128xf32>
    %237 = math.exp %236 : vector<2x128xf32>
    %cst_155 = arith.constant dense<0.000000e+00> : vector<2xf32>
    %238 = vector.multi_reduction <add>, %237, %cst_155 [1] : vector<2x128xf32> to vector<2xf32>
    %239 = vector.shape_cast %238 : vector<2xf32> to vector<2x1xf32>
    %240 = tpu.reciprocal %239 {approx = true} : vector<2x1xf32> -> vector<2x1xf32>
    %241 = vector.broadcast %240 : vector<2x1xf32> to vector<2x128xf32>
    %242 = arith.mulf %237, %241 : vector<2x128xf32>
    %c0_156 = arith.constant 0 : index
    %c0_157 = arith.constant 0 : index
    %243 = vector.load %arg25[%c0_156, %c0_157] : memref<2x128xf32, #tpu.memory_space<vmem>>, vector<2x128xf32>
    tpu.vector_store %arg25[%c0_156, %c0_157], %242 {strides = array<i32>} : memref<2x128xf32, #tpu.memory_space<vmem>>, vector<2x128xf32>,
    %c0_158 = arith.constant 0 : index
    %c0_159 = arith.constant 0 : index
    %244 = vector.load %arg2[%c0_158, %c0_159] : memref<2x32xf32, #tpu.memory_space<vmem>>, vector<2x32xf32>
    %c0_160 = arith.constant 0 : index
    %c0_161 = arith.constant 0 : index
    %245 = vector.load %arg23[%c0_160, %c0_161] : memref<32x128xf32, #tpu.memory_space<vmem>>, vector<32x128xf32>
    %cst_162 = arith.constant dense<0.000000e+00> : vector<2x128xf32>
    %246 = tpu.matmul %244, %245, %cst_162 {dimension_numbers = #tpu.dot_dimension_numbers<[1], [0], [0], [1], [0, 0, 1, 1], [], []>} : vector<2x32xf32>, vector<32x128xf32>, vector<2x128xf32> -> vector<2x128xf32>
    %c0_163 = arith.constant 0 : index
    %c0_164 = arith.constant 0 : index
    %247 = vector.load %arg24[%c0_163, %c0_164] : memref<1x128xf32, #tpu.memory_space<vmem>>, vector<1x128xf32>
    %248 = vector.broadcast %247 : vector<1x128xf32> to vector<2x128xf32>
    %249 = arith.addf %246, %248 : vector<2x128xf32>
    %cst_165 = arith.constant dense<0xFF800000> : vector<2xf32>
    %250 = vector.multi_reduction <maximumf>, %249, %cst_165 [1] : vector<2x128xf32> to vector<2xf32>
    %251 = vector.shape_cast %250 : vector<2xf32> to vector<2x1xf32>
    %252 = vector.broadcast %251 : vector<2x1xf32> to vector<2x128xf32>
    %253 = arith.subf %249, %252 : vector<2x128xf32>
    %254 = math.exp %253 : vector<2x128xf32>
    %cst_166 = arith.constant dense<0.000000e+00> : vector<2xf32>
    %255 = vector.multi_reduction <add>, %254, %cst_166 [1] : vector<2x128xf32> to vector<2xf32>
    %256 = vector.shape_cast %255 : vector<2xf32> to vector<2x1xf32>
    %257 = tpu.reciprocal %256 {approx = true} : vector<2x1xf32> -> vector<2x1xf32>
    %258 = vector.broadcast %257 : vector<2x1xf32> to vector<2x128xf32>
    %259 = arith.mulf %254, %258 : vector<2x128xf32>
    %c0_167 = arith.constant 0 : index
    %c0_168 = arith.constant 0 : index
    %260 = vector.load %arg3[%c0_167, %c0_168] : memref<2x128xf32, #tpu.memory_space<vmem>>, vector<2x128xf32>
    %cst_169 = arith.constant 9.99999968E-21 : f32
    %261 = vector.broadcast %cst_169 : f32 to vector<2x128xf32>
    %262 = arith.addf %260, %261 : vector<2x128xf32>
    %263 = math.log %262 : vector<2x128xf32>
    %cst_170 = arith.constant 0.000000e+00 : f32
    %264 = vector.broadcast %cst_170 : f32 to vector<2x128xf32>
    %265 = arith.subf %264, %263 : vector<2x128xf32>
    %cst_171 = arith.constant 9.99999968E-21 : f32
    %266 = vector.broadcast %cst_171 : f32 to vector<2x128xf32>
    %267 = arith.addf %265, %266 : vector<2x128xf32>
    %268 = math.log %267 : vector<2x128xf32>
    %cst_172 = arith.constant 0.000000e+00 : f32
    %269 = vector.broadcast %cst_172 : f32 to vector<2x128xf32>
    %270 = arith.subf %269, %268 : vector<2x128xf32>
    %271 = arith.addf %259, %270 : vector<2x128xf32>
    %cst_173 = arith.constant 3.33333325 : f32
    %272 = vector.broadcast %cst_173 : f32 to vector<2x128xf32>
    %273 = arith.mulf %271, %272 : vector<2x128xf32>
    %274 = tpu.iota {dimensions = array<i32: 1>} : vector<2x128xi32>
    %c20_i32 = arith.constant 20 : i32
    %275 = vector.broadcast %c20_i32 : i32 to vector<2x128xi32>
    %276 = arith.cmpi slt, %274, %275 : vector<2x128xi32>
    %cst_174 = arith.constant -1.000000e+30 : f32
    %277 = vector.broadcast %cst_174 : f32 to vector<2x128xf32>
    %278 = arith.select %276, %273, %277 : vector<2x128xi1>, vector<2x128xf32>
    %cst_175 = arith.constant dense<0xFF800000> : vector<2xf32>
    %279 = vector.multi_reduction <maximumf>, %278, %cst_175 [1] : vector<2x128xf32> to vector<2xf32>
    %280 = vector.shape_cast %279 : vector<2xf32> to vector<2x1xf32>
    %281 = vector.broadcast %280 : vector<2x1xf32> to vector<2x128xf32>
    %282 = arith.subf %278, %281 : vector<2x128xf32>
    %283 = math.exp %282 : vector<2x128xf32>
    %cst_176 = arith.constant dense<0.000000e+00> : vector<2xf32>
    %284 = vector.multi_reduction <add>, %283, %cst_176 [1] : vector<2x128xf32> to vector<2xf32>
    %285 = vector.shape_cast %284 : vector<2xf32> to vector<2x1xf32>
    %286 = tpu.reciprocal %285 {approx = true} : vector<2x1xf32> -> vector<2x1xf32>
    %287 = vector.broadcast %286 : vector<2x1xf32> to vector<2x128xf32>
    %288 = arith.mulf %283, %287 : vector<2x128xf32>
    %cst_177 = arith.constant dense<0xFF800000> : vector<2xf32>
    %289 = vector.multi_reduction <maximumf>, %288, %cst_177 [1] : vector<2x128xf32> to vector<2xf32>
    %290 = vector.shape_cast %289 : vector<2xf32> to vector<2x1xf32>
    %291 = vector.broadcast %290 : vector<2x1xf32> to vector<2x128xf32>
    %292 = arith.cmpf oeq, %288, %291 : vector<2x128xf32>
    %c128_i32 = arith.constant 128 : i32
    %293 = vector.broadcast %c128_i32 : i32 to vector<2x128xi32>
    %294 = arith.select %292, %274, %293 : vector<2x128xi1>, vector<2x128xi32>
    %cst_178 = arith.constant dense<2147483647> : vector<2xi32>
    %295 = vector.multi_reduction <minsi>, %294, %cst_178 [1] : vector<2x128xi32> to vector<2xi32>
    %296 = vector.shape_cast %295 : vector<2xi32> to vector<2x1xi32>
    %297 = vector.broadcast %296 : vector<2x1xi32> to vector<2x128xi32>
    %298 = arith.cmpi eq, %274, %297 : vector<2x128xi32>
    %299 = arith.extui %298 : vector<2x128xi1> to vector<2x128xi32>
    %300 = arith.sitofp %299 : vector<2x128xi32> to vector<2x128xf32>
    %301 = arith.subf %300, %288 : vector<2x128xf32>
    %302 = arith.addf %301, %288 : vector<2x128xf32>
    %c0_179 = arith.constant 0 : index
    %c0_180 = arith.constant 0 : index
    %303 = vector.load %arg26[%c0_179, %c0_180] : memref<2x128xf32, #tpu.memory_space<vmem>>, vector<2x128xf32>
    tpu.vector_store %arg26[%c0_179, %c0_180], %302 {strides = array<i32>} : memref<2x128xf32, #tpu.memory_space<vmem>>, vector<2x128xf32>,
    return
  }
}

</mosaic_0001>

<bundles_post_ra>
// kernel: tpu_custom_call.1
= control target key start
LH: loop header
LB: loop body
LE: loop exit
PB: predicated region body
PF: predicated region fallthrough
CT: control target
= control target key end

     0   :  { %s5554_s0 = inlined_call_operand.vmem [shape: f32[32,32], index: 0, kind: input, shape index: {}]   ;;  %s5555_s1 = inlined_call_operand.vmem [shape: f32[16,32], index: 1, kind: input, shape index: {}]   ;;  %s5556_s2 = inlined_call_operand.vmem [shape: f32[2,32], index: 2, kind: input, shape index: {}]   ;;  %s5557_s3 = inlined_call_operand.vmem [shape: f32[2,128], index: 3, kind: input, shape index: {}]   ;;  %s5558_s4 = inlined_call_operand.vmem [shape: f32[2,32], index: 4, kind: input, shape index: {}]   ;;  %s5559_s5 = inlined_call_operand.vmem [shape: f32[4,32,8], index: 5, kind: input, shape index: {}]   ;;  %s5560_s6 = inlined_call_operand.vmem [shape: f32[4,1,8], index: 6, kind: input, shape index: {}]   ;;  %s5561_s7 = inlined_call_operand.vmem [shape: f32[4,32,8], index: 7, kind: input, shape index: {}]   ;;  %s5562_s8 = inlined_call_operand.vmem [shape: f32[4,1,8], index: 8, kind: input, shape index: {}]   ;;  %s5563_s9 = inlined_call_operand.vmem [shape: f32[4,32,8], index: 9, kind: input, shape index: {}]   ;;  %s5564_s10 = inlined_call_operand.vmem [shape: f32[4,1,8], index: 10, kind: input, shape index: {}]   ;;  %s5565_s11 = inlined_call_operand.vmem [shape: f32[4,8,32], index: 11, kind: input, shape index: {}]   ;;  %s5566_s12 = inlined_call_operand.vmem [shape: f32[1,32], index: 12, kind: input, shape index: {}]   ;;  %s5567_s13 = inlined_call_operand.vmem [shape: f32[1,32], index: 13, kind: input, shape index: {}]   ;;  %s5568_s14 = inlined_call_operand.vmem [shape: f32[1,32], index: 14, kind: input, shape index: {}]   ;;  %s5569_s15 = inlined_call_operand.vmem [shape: f32[32,64], index: 15, kind: input, shape index: {}]   ;;  %s5570_s16 = inlined_call_operand.vmem [shape: f32[1,64], index: 16, kind: input, shape index: {}]   ;;  %s5571_s17 = inlined_call_operand.vmem [shape: f32[64,32], index: 17, kind: input, shape index: {}]   ;;  %s5572_s18 = inlined_call_operand.vmem [shape: f32[1,32], index: 18, kind: input, shape index: {}]   ;;  %s5573_s19 = inlined_call_operand.vmem [shape: f32[1,32], index: 19, kind: input, shape index: {}]   ;;  %s5574_s20 = inlined_call_operand.vmem [shape: f32[1,32], index: 20, kind: input, shape index: {}]   ;;  %s5575_s21 = inlined_call_operand.vmem [shape: f32[32,128], index: 21, kind: input, shape index: {}]   ;;  %s5576_s22 = inlined_call_operand.vmem [shape: f32[1,128], index: 22, kind: input, shape index: {}]   ;;  %s5577_s23 = inlined_call_operand.vmem [shape: f32[32,128], index: 23, kind: input, shape index: {}]   ;;  %s5578_s24 = inlined_call_operand.vmem [shape: f32[1,128], index: 24, kind: input, shape index: {}]   ;;  %s5579_s25 = inlined_call_operand.hbm [shape: f32[2,128], index: 25, kind: output, shape index: {0}]   ;;  %s5580_s26 = inlined_call_operand.hbm [shape: f32[2,128], index: 26, kind: output, shape index: {1}]  }
   0x1   :  { %5591 = sst [smem:[#allocation8_spill]] %s5554_s0 }
   0x2   :  { %5592 = sst [smem:[#allocation9_spill]] %s5555_s1 }
   0x3   :  { %5593 = sst [smem:[#allocation10_spill]] %s5556_s2 }
   0x4   :  { %5594 = sst [smem:[#allocation11_spill]] %s5557_s3 }
   0x5   :  { %5595 = sst [smem:[#allocation12_spill]] %s5558_s4 }
   0x6   :  { %5596 = sst [smem:[#allocation13_spill]] %s5559_s5 }
   0x7   :  { %5597 = sst [smem:[#allocation14_spill]] %s5560_s6 }
   0x8   :  { %5598 = sst [smem:[#allocation15_spill]] %s5561_s7 }
   0x9   :  { %5599 = sst [smem:[#allocation16_spill]] %s5562_s8 }
   0xa   :  { %5600 = sst [smem:[#allocation17_spill]] %s5563_s9 }
   0xb   :  { %5601 = sst [smem:[#allocation18_spill]] %s5564_s10 }
   0xc   :  { %5602 = sst [smem:[#allocation19_spill]] %s5579_s25 }
   0xd   :  { %5603 = sst [smem:[#allocation20_spill]] %s5580_s26 }
   0xe   :  { %32 = vsyncpa [#allocation3], 0  ;;  %s5604_s7 = sld [smem:[#allocation15_spill]]  ;;  %s5605_s0 = sld [smem:[#allocation13_spill]]  ;;  %vm112_vm0 = vcmask 261120  }
   0xf   :  { %s5606_s29 = sld [smem:[#allocation9_spill]]  ;;  %s5607_s2 = sld [smem:[#allocation8_spill]] }
  0x14   :  { %v210_v0 = vld [vmem:[%s5604_s7] sm:$0xff]  ;;  %v211_v1 = vld [vmem:[%s5604_s7 + $0x8] sm:$0xff]  ;;  %v212_v5 = vld [vmem:[%s5604_s7 + $0x10] sm:$0xff] }
  0x15   :  { %v101_v2 = vld [vmem:[%s5605_s0] sm:$0xff]  ;;  %v4528_v3 = vpack.c.bf16 %v211_v1, %v210_v0  ;;  %v102_v4 = vld [vmem:[%s5605_s0 + $0x8] sm:$0xff]  ;;  %v213_v6 = vld [vmem:[%s5604_s7 + $0x18] sm:$0xff] }
  0x16   :  { %v4520_v7 = vpack.c.bf16 %v102_v4, %v101_v2  ;;  %v4532_v8 = vpack.c.bf16 %v213_v6, %v212_v5  ;;  %v103_v9 = vld [vmem:[%s5605_s0 + $0x10] sm:$0xff]  ;;  %v104_v10 = vld [vmem:[%s5605_s0 + $0x18] sm:$0xff]  ;;  %v4994_v11 = vld [vmem:[%s5606_s29] sm:$0xff] }
  0x17   :  { %4529 = vmatprep.subr.bf16.mxu1 %v4528_v3  ;;  %v4524_v12 = vpack.c.bf16 %v104_v10, %v103_v9  ;;  %4217 = vmatprep.mubr.msk.f32.mxu1 %vm112_vm0, %v4994_v11  ;;  %v5001_v13 = vld [vmem:[%s5607_s2] sm:$0xff] }
  0x18   :  { %4531 = vmatpush3.bf16.msra.mxu1 %v4528_v3  ;;  %4521 = vmatprep.subr.bf16.mxu0 %v4520_v7 }
  0x19   :  { %33 = vsyncpa [#allocation5], 0  ;;  %4523 = vmatpush3.bf16.msra.mxu0 %v4520_v7  ;;  %4533 = vmatprep.subr.bf16.mxu1 %v4532_v8  ;;  %v5008_v14 = vld [vmem:[%s5606_s29 + $0x8] sm:$0xff]  ;;  %v5018_v16 = vld [vmem:[%s5607_s2 + $0x10] sm:$0xff]  ;;  %s5608_s9 = sld [smem:[#allocation16_spill]]  ;;  %s5609_s10 = sld [smem:[#allocation14_spill]] }
  0x1a   :  { %4525 = vmatprep.subr.bf16.mxu0 %v4524_v12  ;;  %4203 = vmatprep.mubr.msk.f32.mxu0 %vm112_vm0, %v5001_v13  ;;  %v5013_v15 = vld [vmem:[%s5607_s2 + $0x8] sm:$0xff]  ;;  %v5029_v17 = vld [vmem:[%s5607_s2 + $0x18] sm:$0xff]  ;;  %vm388_vm1 = vcmask 64512   ;;  %s5610_s27 = sld [smem:[#allocation17_spill]]  ;;  %s5611_s1 = sld [smem:[#allocation18_spill]]  ;;  %v763_v7 = vld [vmem:[%s5565_s11] sm:$0xff] }
  0x1b   :  { %vm4828_vm2 = vmmov 0   ;;  %vm3320_vm3 = vcmask 523264   ;;  %vm3654_vm4 = vcmask 1041408   ;;  %s5613_s28 = sld [smem:[#allocation12_spill]] }
  0x1c   :  { %4535 = vmatpush3.bf16.msra.mxu1 %v4532_v8 }
  0x1d   :  { %4527 = vmatpush3.bf16.msra.mxu0 %v4524_v12 }
  0x1f   :  { %4218 = vmatmul.mubr.msk.f32.vlgmr.msra.gmra.mrb[0].mxu1 %vm112_vm0, %v5008_v14  ;;  %v3849_v18 = vld [vmem:[%s5608_s9] ss:$0 sm:$0xff] }
  0x20   :  { %4204 = vmatmul.mubr.msk.f32.vlgmr.msra.gmra.mrb[0].mxu0 %vm112_vm0, %v5013_v15  ;;  %v3844_v20 = vld [vmem:[%s5609_s10] ss:$0 sm:$0xff]  ;;  %v303_v33 = vld [vmem:[%s5610_s27 + $0x8] sm:$0xff]  ;;  %v304_v34 = vld [vmem:[%s5610_s27 + $0x10] sm:$0xff] }
  0x21   :  { %4206 = vmatprep.mubr.msk.f32.mxu0 %vm112_vm0, %v5018_v16  ;;  %v302_v32 = vld [vmem:[%s5610_s27] sm:$0xff]  ;;  %v305_v36 = vld [vmem:[%s5610_s27 + $0x18] sm:$0xff] }
  0x22   :  { %v4536_v35 = vpack.c.bf16 %v303_v33, %v302_v32  ;;  %v4540_v37 = vpack.c.bf16 %v305_v36, %v304_v34  ;;  %v3852_v3 = vld [vmem:[%s5611_s1] ss:$0 sm:$0xff]  ;;  %v3871_v32 = vld [vmem:[%s5605_s0 + $0x30] sm:$0xff]  ;;  %v3872_v33 = vld [vmem:[%s5605_s0 + $0x38] sm:$0xff] }
  0x23   :  { %v4548_v34 = vpack.c.bf16 %v3872_v33, %v3871_v32  ;;  %v3882_v36 = vld [vmem:[%s5604_s7 + $0x38] sm:$0xff]  ;;  %v3892_v33 = vld [vmem:[%s5611_s1 + $0x1] ss:$0 sm:$0xff] }
  0x24   :  { %4207 = vmatmul.mubr.msk.f32.gmra.mrb[2].mxu0 %vm112_vm0, %v5029_v17  ;;  %4537 = vmatprep.subr.bf16.mxu0 %v4536_v35 }
  0x25   :  { %4228 = vmatprep.mubr.msk.f32.mxu0 %vm112_vm0, %v4994_v11  ;;  %4539 = vmatpush3.bf16.msra.mxu0 %v4536_v35  ;;  %v3881_v35 = vld [vmem:[%s5604_s7 + $0x30] sm:$0xff] }
  0x26   :  { %4541 = vmatprep.subr.bf16.mxu0 %v4540_v37 }
  0x29   :  { %4543 = vmatpush3.bf16.msra.mxu0 %v4540_v37 }
  0x2a   :  { %4251 = vmatprep.subr.mxu0 %v763_v7 }
  0x2c   :  { %4229 = vmatmul.mubr.msk.f32.vlgmr.msra.gmra.mrb[4].mxu0 %vm112_vm0, %v5008_v14 }
  0x2d   :  { %4252 = vmatpush3.msra.mxu0 %v763_v7 }
  0xf2   :  { %v4219_v19 = vpop.f32.mrb[0].mxu1 }
  0xf3   :  { %v293_v21 = vpop.f32.mrb[1].mxu1  ;;  %v4205_v22 = vpop.f32.mrb[0].mxu0  ;;  %v299_v26 = vadd.f32 %v4219_v19, %v3849_v18 }
  0xf4   :  { %v294_v23 = vadd.f32 %v3849_v18, %v293_v21  ;;  %v191_v24 = vpop.f32.mrb[1].mxu0  ;;  %v197_v28 = vadd.f32 %v4205_v22, %v3844_v20 }
  0xf5   :  { %v192_v25 = vadd.f32 %v3844_v20, %v191_v24 }
  0xf6   :  { %4231 = vmatprep.subr.msk.mxu1 %vm388_vm1, %v294_v23 }
  0xf7   :  { %4232 = vmatpush3.xpose.msk.msra.mxu1 %vm388_vm1, %v294_v23  ;;  %v4208_v27 = vpop.f32.mrb[2].mxu0  ;;  %4233 = vmatprep.mubr.msk.f32.mxu1 %vm388_vm1, %v192_v25 }
  0xf8   :  { %4236 = vmatprep.subr.msk.mxu1 %vm388_vm1, %v299_v26  ;;  %v201_v29 = vpop.f32.mrb[3].mxu0  ;;  %v207_v31 = vadd.f32 %v4208_v27, %v3844_v20  ;;  %v3880_v27 = vld [vmem:[%s5604_s7 + $0x28] sm:$0xff] }
  0xf9   :  { %v202_v30 = vadd.f32 %v3844_v20, %v201_v29  ;;  %v3869_v29 = vld [vmem:[%s5605_s0 + $0x20] sm:$0xff] }
  0xfa   :  { %4234 = vmatmul.mubr.msk.f32.vlgmr.msra.gmra.mrb[2].mxu1 %vm388_vm1, %v197_v28 }
  0xfb   :  { %4237 = vmatpush3.xpose.msk.msra.mxu1 %vm388_vm1, %v299_v26  ;;  %4238 = vmatprep.mubr.msk.f32.mxu1 %vm388_vm1, %v202_v30  ;;  %v3879_v26 = vld [vmem:[%s5604_s7 + $0x20] sm:$0xff]  ;;  %v3870_v30 = vld [vmem:[%s5605_s0 + $0x28] sm:$0xff] }
  0xfc   :  { %v4552_v28 = vpack.c.bf16 %v3880_v27, %v3879_v26 }
  0xfe   :  { %4239 = vmatmul.mubr.msk.f32.vlgmr.msra.gmra.mrb[4].mxu1 %vm388_vm1, %v207_v31  ;;  %4553 = vmatprep.subr.bf16.mxu0 %v4552_v28  ;;  %v4544_v31 = vpack.c.bf16 %v3870_v30, %v3869_v29 }
  0xff   :  { %v4230_v2 = vpop.f32.mrb[4].mxu0 }
 0x100   :  { %v379_v4 = vpop.f32.mrb[5].mxu0  ;;  %v385_v6 = vadd.f32 %v4230_v2, %v3852_v3 }
 0x101   :  { %v380_v5 = vadd.f32 %v3852_v3, %v379_v4 }
 0x103   :  { %4241 = vmatprep.subr.mxu1 %v380_v5 }
 0x104   :  { %4242 = vmatpush3.msra.mxu1 %v380_v5 }
 0x105   :  { %4246 = vmatprep.subr.mxu1 %v385_v6 }
 0x1cd   :  { %v4235_v38 = vpop.f32.mrb[2].mxu1 }
 0x1ce   :  { %v464_v39 = vpop.f32.mrb[3].mxu1  ;;  %v560_v43 = vsel %vm388_vm1, %v4235_v38, -inf }
 0x1cf   :  { %v557_v40 = vsel %vm388_vm1, %v464_v39, -inf }
 0x1d0   :  { %558 = vmax.xlane.f32.xlu0 %v557_v40 }
 0x1d1   :  { %v4240_v41 = vpop.f32.mrb[4].mxu1 }
 0x1d2   :  { %v548_v42 = vpop.f32.mrb[5].mxu1  ;;  %v566_v45 = vsel %vm388_vm1, %v4240_v41, -inf }
 0x1d3   :  { %v563_v44 = vsel %vm388_vm1, %v548_v42, -inf }
 0x1d4   :  { %561 = vmax.xlane.f32.xlu0 %v560_v43  ;;  %564 = vmax.xlane.f32.xlu1 %v563_v44 }
 0x1d8   :  { %567 = vmax.xlane.f32.xlu1 %v566_v45 }
 0x25d   :  { %v559_v46 = vpop.xlane.xlu0 %558 }
 0x25e   :  { %v569_v47 = vsub.f32 %v464_v39, %v559_v46  ;;  %v4556_v39 = vpack.c.bf16 %v3882_v36, %v3881_v35 }
 0x260   :  { %v573_v48 = vmul.f32 1.442695, %v569_v47 }
 0x261   :  { %v562_v49 = vpop.xlane.xlu0 %561  ;;  %v565_v50 = vpop.xlane.xlu1 %564 }
 0x262   :  { %4679 = vpow2.f32 %v573_v48  ;;  %v570_v51 = vsub.f32 %v4235_v38, %v562_v49  ;;  %v571_v52 = vsub.f32 %v548_v42, %v565_v50  ;;  %v3874_v42 = vld [vmem:[%s5609_s10 + $0x1] ss:$0 sm:$0xff] }
 0x264   :  { %v575_v53 = vmul.f32 1.442695, %v570_v51  ;;  %v577_v54 = vmul.f32 1.442695, %v571_v52  ;;  %v3884_v51 = vld [vmem:[%s5608_s9 + $0x1] ss:$0 sm:$0xff] }
 0x265   :  { %v568_v55 = vpop.xlane.xlu1 %567 }
 0x266   :  { %4681 = vpow2.f32 %v575_v53  ;;  %v572_v56 = vsub.f32 %v4240_v41, %v568_v55 }
 0x267   :  { %4683 = vpow2.f32 %v577_v54 }
 0x268   :  { %v579_v57 = vmul.f32 1.442695, %v572_v56  ;;  %v3887_v56 = vld [vmem:[%s5610_s27 + $0x20] sm:$0xff] }
 0x26a   :  { %4685 = vpow2.f32 %v579_v57  ;;  %v3888_v57 = vld [vmem:[%s5610_s27 + $0x28] sm:$0xff] }
 0x26c   :  { %v4680_v58 = vpop.eup %4679 }
 0x26d   :  { %v581_v59 = vsel %vm388_vm1, %v4680_v58, 0.0 }
 0x26e   :  { %582 = vadd.xlane.f32.xlu0 %v581_v59  ;;  %v4560_v59 = vpack.c.bf16 %v3888_v57, %v3887_v56  ;;  %v3912_v56 = vld [vmem:[%s5605_s0 + $0x50] sm:$0xff]  ;;  %v3913_v57 = vld [vmem:[%s5605_s0 + $0x58] sm:$0xff] }
 0x270   :  { %v4682_v60 = vpop.eup %4681 }
 0x271   :  { %v4684_v61 = vpop.eup %4683  ;;  %v584_v62 = vsel %vm388_vm1, %v4682_v60, 0.0 }
 0x272   :  { %585 = vadd.xlane.f32.xlu1 %v584_v62  ;;  %v587_v63 = vsel %vm388_vm1, %v4684_v61, 0.0 }
 0x273   :  { %588 = vadd.xlane.f32.xlu0 %v587_v63 }
 0x274   :  { %v4686_v0 = vpop.eup %4685 }
 0x275   :  { %v590_v1 = vsel %vm388_vm1, %v4686_v0, 0.0 }
 0x276   :  { %591 = vadd.xlane.f32.xlu1 %v590_v1 }
 0x2fb   :  { %v583_v8 = vpop.xlane.xlu0 %582 }
 0x2fc   :  { %4687 = vrcp.f32 %v583_v8 }
 0x2ff   :  { %v586_v9 = vpop.xlane.xlu1 %585 }
 0x300   :  { %v589_v10 = vpop.xlane.xlu0 %588  ;;  %4689 = vrcp.f32 %v586_v9 }
 0x301   :  { %4691 = vrcp.f32 %v589_v10 }
 0x303   :  { %v592_v12 = vpop.xlane.xlu1 %591 }
 0x304   :  { %4693 = vrcp.f32 %v592_v12 }
 0x306   :  { %v4688_v18 = vpop.eup %4687 }
 0x307   :  { %v597_v19 = vmul.f32 %v4688_v18, %v4680_v58  ;;  %v3889_v58 = vld [vmem:[%s5610_s27 + $0x30] sm:$0xff] }
 0x309   :  { %4243 = vmatprep.mubr.msk.f32.mxu1 %vm388_vm1, %v597_v19 }
 0x30a   :  { %v4690_v20 = vpop.eup %4689 }
 0x30b   :  { %v4692_v21 = vpop.eup %4691  ;;  %v598_v22 = vmul.f32 %v4690_v20, %v4682_v60  ;;  %v3890_v60 = vld [vmem:[%s5610_s27 + $0x38] sm:$0xff] }
 0x30c   :  { %v599_v23 = vmul.f32 %v4692_v21, %v4684_v61  ;;  %v4564_v61 = vpack.c.bf16 %v3890_v60, %v3889_v58  ;;  %v4572_v58 = vpack.c.bf16 %v3913_v57, %v3912_v56  ;;  %v3929_v60 = vld [vmem:[%s5610_s27 + $0x48] sm:$0xff] }
 0x30d   :  { %4244 = vmatmul.mubr.msk.f32.vlgmr.msra.gmra.mrb[6].mxu1 %vm388_vm1, %v598_v22 }
 0x30e   :  { %v4694_v24 = vpop.eup %4693  ;;  %4247 = vmatpush3.msra.mxu1 %v385_v6  ;;  %4248 = vmatprep.mubr.msk.f32.mxu1 %vm388_vm1, %v599_v23 }
 0x30f   :  { %v600_v25 = vmul.f32 %v4694_v24, %v4686_v0  ;;  %4545 = vmatprep.subr.bf16.mxu1 %v4544_v31 }
 0x311   :  { %4249 = vmatmul.mubr.msk.f32.vlgmr.msra.gmra.mrb[8].mxu1 %vm388_vm1, %v600_v25 }
 0x312   :  { %4267 = vmatprep.mubr.msk.f32.mxu1 %vm112_vm0, %v5001_v13  ;;  %4547 = vmatpush3.bf16.msra.mxu1 %v4544_v31 }
 0x313   :  { %4549 = vmatprep.subr.bf16.mxu1 %v4548_v34 }
 0x316   :  { %4551 = vmatpush3.bf16.msra.mxu1 %v4548_v34 }
 0x317   :  { %4561 = vmatprep.subr.bf16.mxu1 %v4560_v59 }
 0x319   :  { %4268 = vmatmul.mubr.msk.f32.vlgmr.msra.gmra.mrb[10].mxu1 %vm112_vm0, %v5013_v15 }
 0x31a   :  { %4270 = vmatprep.mubr.msk.f32.mxu1 %vm112_vm0, %v5018_v16  ;;  %4563 = vmatpush3.bf16.msra.mxu1 %v4560_v59  ;;  %v3928_v59 = vld [vmem:[%s5610_s27 + $0x40] sm:$0xff] }
 0x31b   :  { %4565 = vmatprep.subr.bf16.mxu1 %v4564_v61 }
 0x31d   :  { %4271 = vmatmul.mubr.msk.f32.gmra.mrb[12].mxu1 %vm112_vm0, %v5029_v17 }
 0x31e   :  { %4292 = vmatprep.mubr.msk.f32.mxu1 %vm112_vm0, %v4994_v11  ;;  %4567 = vmatpush3.bf16.msra.mxu1 %v4564_v61  ;;  %v3930_v61 = vld [vmem:[%s5610_s27 + $0x50] sm:$0xff] }
 0x321   :  { %4293 = vmatmul.mubr.msk.f32.vlgmr.msra.gmra.mrb[14].mxu1 %vm112_vm0, %v5008_v14 }
 0x3e0   :  { %v4245_v37 = vpop.f32.mrb[6].mxu1 }
 0x3e1   :  { %v673_v38 = vpop.f32.mrb[7].mxu1 }
 0x3e2   :  { %4253 = vmatprep.mubr.msk.f32.mxu0 %vm388_vm1, %v673_v38 }
 0x3e3   :  { %4254 = vmatmul.mubr.msk.f32.vlgmr.msra.gmra.mrb[6].mxu0 %vm388_vm1, %v4245_v37  ;;  %v3905_v37 = vld [vmem:[%s5565_s11 + $0x8] sm:$0xff] }
 0x3e4   :  { %v4250_v40 = vpop.f32.mrb[8].mxu1  ;;  %4555 = vmatpush3.bf16.msra.mxu0 %v4552_v28 }
 0x3e5   :  { %v754_v41 = vpop.f32.mrb[9].mxu1  ;;  %4557 = vmatprep.subr.bf16.mxu0 %v4556_v39 }
 0x3e6   :  { %4256 = vmatprep.mubr.msk.f32.mxu0 %vm388_vm1, %v754_v41 }
 0x3e7   :  { %4257 = vmatmul.mubr.msk.f32.gmra.mrb[8].mxu0 %vm388_vm1, %v4250_v40 }
 0x3e8   :  { %4559 = vmatpush3.bf16.msra.mxu0 %v4556_v39  ;;  %4281 = vmatprep.mubr.msk.f32.mxu0 %vm112_vm0, %v4994_v11 }
 0x3eb   :  { %4282 = vmatmul.mubr.msk.f32.vlgmr.msra.gmra.mrb[10].mxu0 %vm112_vm0, %v5008_v14 }
 0x3ec   :  { %v4269_v43 = vpop.f32.mrb[10].mxu1 }
 0x3ed   :  { %v950_v44 = vadd.f32 %v4269_v43, %v3874_v42  ;;  %v944_v45 = vpop.f32.mrb[11].mxu1 }
 0x3ee   :  { %v945_v46 = vadd.f32 %v3874_v42, %v944_v45 }
 0x3f0   :  { %v4272_v47 = vpop.f32.mrb[12].mxu1  ;;  %4297 = vmatprep.mubr.msk.f32.mxu0 %vm388_vm1, %v945_v46 }
 0x3f1   :  { %v960_v48 = vadd.f32 %v4272_v47, %v3874_v42  ;;  %v954_v49 = vpop.f32.mrb[13].mxu1 }
 0x3f2   :  { %v955_v50 = vadd.f32 %v3874_v42, %v954_v49 }
 0x3f4   :  { %v4294_v32 = vpop.f32.mrb[14].mxu1 }
 0x3f5   :  { %v1130_v34 = vpop.f32.mrb[15].mxu1  ;;  %v1136_v35 = vadd.f32 %v4294_v32, %v3892_v33 }
 0x3f6   :  { %v1131_v36 = vadd.f32 %v3892_v33, %v1130_v34 }
 0x3f8   :  { %4305 = vmatprep.subr.mxu1 %v1131_v36 }
 0x3f9   :  { %4306 = vmatpush3.msra.mxu1 %v1131_v36 }
 0x4be   :  { %v4283_v52 = vpop.f32.mrb[10].mxu0 }
 0x4bf   :  { %v1042_v53 = vpop.f32.mrb[11].mxu0  ;;  %v1048_v55 = vadd.f32 %v4283_v52, %v3884_v51  ;;  %v3920_v52 = vld [vmem:[%s5604_s7 + $0x40] sm:$0xff] }
 0x4c0   :  { %v1043_v54 = vadd.f32 %v3884_v51, %v1042_v53  ;;  %v3911_v51 = vld [vmem:[%s5605_s0 + $0x48] sm:$0xff] }
 0x4c2   :  { %4295 = vmatprep.subr.msk.mxu0 %vm388_vm1, %v1043_v54 }
 0x4c3   :  { %4296 = vmatpush3.xpose.msk.msra.mxu0 %vm388_vm1, %v1043_v54  ;;  %v3921_v54 = vld [vmem:[%s5604_s7 + $0x48] sm:$0xff] }
 0x4c4   :  { %4300 = vmatprep.subr.msk.mxu0 %vm388_vm1, %v1048_v55 }
 0x4c6   :  { %4298 = vmatmul.mubr.msk.f32.vlgmr.msra.gmra.mrb[12].mxu0 %vm388_vm1, %v950_v44 }
 0x4c7   :  { %4301 = vmatpush3.xpose.msk.msra.mxu0 %vm388_vm1, %v1048_v55  ;;  %4302 = vmatprep.mubr.msk.f32.mxu0 %vm388_vm1, %v955_v50  ;;  %v3910_v50 = vld [vmem:[%s5605_s0 + $0x40] sm:$0xff]  ;;  %v4576_v55 = vpack.c.bf16 %v3921_v54, %v3920_v52 }
 0x4c8   :  { %4310 = vmatprep.subr.mxu0 %v1136_v35  ;;  %v4568_v53 = vpack.c.bf16 %v3911_v51, %v3910_v50 }
 0x4ca   :  { %4303 = vmatmul.mubr.msk.f32.vlgmr.msra.gmra.mrb[14].mxu0 %vm388_vm1, %v960_v48  ;;  %4569 = vmatprep.subr.bf16.mxu1 %v4568_v53 }
 0x4cb   :  { %4311 = vmatpush3.msra.mxu0 %v1136_v35 }
 0x4cc   :  { %4315 = vmatprep.subr.mxu0 %v3905_v37 }
 0x599   :  { %v4299_v62 = vpop.f32.mrb[12].mxu0 }
 0x59a   :  { %v1214_v63 = vpop.f32.mrb[13].mxu0  ;;  %v1310_v0 = vsel %vm388_vm1, %v4299_v62, -inf }
 0x59b   :  { %1311 = vmax.xlane.f32.xlu1 %v1310_v0  ;;  %v1307_v1 = vsel %vm388_vm1, %v1214_v63, -inf }
 0x59c   :  { %1308 = vmax.xlane.f32.xlu0 %v1307_v1  ;;  %v3922_v1 = vld [vmem:[%s5604_s7 + $0x50] sm:$0xff] }
 0x59d   :  { %v4304_v2 = vpop.f32.mrb[14].mxu0 }
 0x59e   :  { %v1298_v3 = vpop.f32.mrb[15].mxu0  ;;  %v1316_v4 = vsel %vm388_vm1, %v4304_v2, -inf }
 0x59f   :  { %1317 = vmax.xlane.f32.xlu1 %v1316_v4  ;;  %v1313_v5 = vsel %vm388_vm1, %v1298_v3, -inf }
 0x5a0   :  { %1314 = vmax.xlane.f32.xlu0 %v1313_v5 }
 0x628   :  { %v1312_v6 = vpop.xlane.xlu1 %1311 }
 0x629   :  { %v1320_v7 = vsub.f32 %v4299_v62, %v1312_v6  ;;  %v1309_v8 = vpop.xlane.xlu0 %1308  ;;  %v4584_v62 = vpack.c.bf16 %v3929_v60, %v3928_v59 }
 0x62a   :  { %v1319_v9 = vsub.f32 %v1214_v63, %v1309_v8  ;;  %v3931_v63 = vld [vmem:[%s5610_s27 + $0x58] sm:$0xff] }
 0x62b   :  { %v1325_v10 = vmul.f32 1.442695, %v1320_v7  ;;  %v4588_v0 = vpack.c.bf16 %v3931_v63, %v3930_v61  ;;  %v3946_v61 = vld [vmem:[%s5565_s11 + $0x10] sm:$0xff] }
 0x62c   :  { %v1323_v12 = vmul.f32 1.442695, %v1319_v9  ;;  %v1318_v18 = vpop.xlane.xlu1 %1317  ;;  %v3915_v9 = vld [vmem:[%s5609_s10 + $0x2] ss:$0 sm:$0xff] }
 0x62d   :  { %4695 = vpow2.f32 %v1325_v10  ;;  %v1322_v19 = vsub.f32 %v4304_v2, %v1318_v18  ;;  %v1315_v20 = vpop.xlane.xlu0 %1314  ;;  %v3923_v2 = vld [vmem:[%s5604_s7 + $0x58] sm:$0xff] }
 0x62e   :  { %4697 = vpow2.f32 %v1323_v12  ;;  %v1321_v21 = vsub.f32 %v1298_v3, %v1315_v20  ;;  %v4580_v5 = vpack.c.bf16 %v3923_v2, %v3922_v1 }
 0x62f   :  { %v1329_v22 = vmul.f32 1.442695, %v1322_v19 }
 0x630   :  { %v1327_v23 = vmul.f32 1.442695, %v1321_v21 }
 0x631   :  { %4699 = vpow2.f32 %v1329_v22 }
 0x632   :  { %4701 = vpow2.f32 %v1327_v23 }
 0x637   :  { %v4696_v24 = vpop.eup %4695 }
 0x638   :  { %v4698_v25 = vpop.eup %4697  ;;  %v1334_v26 = vsel %vm388_vm1, %v4696_v24, 0.0 }
 0x639   :  { %1335 = vadd.xlane.f32.xlu1 %v1334_v26  ;;  %v1331_v27 = vsel %vm388_vm1, %v4698_v25, 0.0  ;;  %v3933_v26 = vld [vmem:[%s5611_s1 + $0x2] ss:$0 sm:$0xff] }
 0x63a   :  { %1332 = vadd.xlane.f32.xlu0 %v1331_v27 }
 0x63b   :  { %v4700_v28 = vpop.eup %4699 }
 0x63c   :  { %v4702_v29 = vpop.eup %4701  ;;  %v1340_v30 = vsel %vm388_vm1, %v4700_v28, 0.0 }
 0x63d   :  { %1341 = vadd.xlane.f32.xlu1 %v1340_v30  ;;  %v1337_v31 = vsel %vm388_vm1, %v4702_v29, 0.0 }
 0x63e   :  { %1338 = vadd.xlane.f32.xlu0 %v1337_v31 }
 0x6c6   :  { %v1336_v38 = vpop.xlane.xlu1 %1335 }
 0x6c7   :  { %4703 = vrcp.f32 %v1336_v38  ;;  %v1333_v39 = vpop.xlane.xlu0 %1332 }
 0x6c8   :  { %4705 = vrcp.f32 %v1333_v39 }
 0x6ca   :  { %v1342_v40 = vpop.xlane.xlu1 %1341 }
 0x6cb   :  { %4707 = vrcp.f32 %v1342_v40  ;;  %v1339_v41 = vpop.xlane.xlu0 %1338 }
 0x6cc   :  { %4709 = vrcp.f32 %v1339_v41 }
 0x6d1   :  { %v4704_v42 = vpop.eup %4703 }
 0x6d2   :  { %v4706_v43 = vpop.eup %4705  ;;  %v1348_v45 = vmul.f32 %v4704_v42, %v4696_v24 }
 0x6d3   :  { %v1347_v44 = vmul.f32 %v4706_v43, %v4698_v25  ;;  %v3925_v25 = vld [vmem:[%s5608_s9 + $0x2] ss:$0 sm:$0xff] }
 0x6d5   :  { %v4708_v46 = vpop.eup %4707  ;;  %4307 = vmatprep.mubr.msk.f32.mxu1 %vm388_vm1, %v1347_v44 }
 0x6d6   :  { %v4710_v47 = vpop.eup %4709  ;;  %4308 = vmatmul.mubr.msk.f32.vlgmr.msra.gmra.mrb[16].mxu1 %vm388_vm1, %v1348_v45  ;;  %v1350_v49 = vmul.f32 %v4708_v46, %v4700_v28 }
 0x6d7   :  { %v1349_v48 = vmul.f32 %v4710_v47, %v4702_v29  ;;  %4331 = vmatprep.mubr.msk.f32.mxu1 %vm112_vm0, %v5001_v13  ;;  %4571 = vmatpush3.bf16.msra.mxu1 %v4568_v53 }
 0x6d8   :  { %4573 = vmatprep.subr.bf16.mxu1 %v4572_v58 }
 0x6d9   :  { %4312 = vmatprep.mubr.msk.f32.mxu0 %vm388_vm1, %v1349_v48 }
 0x6da   :  { %4313 = vmatmul.mubr.msk.f32.vlgmr.msra.gmra.mrb[16].mxu0 %vm388_vm1, %v1350_v49 }
 0x6db   :  { %4316 = vmatpush3.msra.mxu0 %v3905_v37  ;;  %4575 = vmatpush3.bf16.msra.mxu1 %v4572_v58 }
 0x6dc   :  { %4577 = vmatprep.subr.bf16.mxu0 %v4576_v55  ;;  %4585 = vmatprep.subr.bf16.mxu1 %v4584_v62 }
 0x6de   :  { %4332 = vmatmul.mubr.msk.f32.vlgmr.msra.gmra.mrb[18].mxu1 %vm112_vm0, %v5013_v15 }
 0x6df   :  { %4334 = vmatprep.mubr.msk.f32.mxu1 %vm112_vm0, %v5018_v16  ;;  %4587 = vmatpush3.bf16.msra.mxu1 %v4584_v62 }
 0x6e0   :  { %4589 = vmatprep.subr.bf16.mxu1 %v4588_v0 }
 0x6e2   :  { %4335 = vmatmul.mubr.msk.f32.gmra.mrb[20].mxu1 %vm112_vm0, %v5029_v17 }
 0x6e3   :  { %4356 = vmatprep.mubr.msk.f32.mxu1 %vm112_vm0, %v4994_v11  ;;  %4591 = vmatpush3.bf16.msra.mxu1 %v4588_v0 }
 0x6e6   :  { %4357 = vmatmul.mubr.msk.f32.vlgmr.msra.gmra.mrb[22].mxu1 %vm112_vm0, %v5008_v14 }
 0x7a9   :  { %v4309_v3 = vpop.f32.mrb[16].mxu1 }
 0x7aa   :  { %v1423_v4 = vpop.f32.mrb[17].mxu1 }
 0x7ab   :  { %4317 = vmatprep.mubr.msk.f32.mxu0 %vm388_vm1, %v1423_v4 }
 0x7ac   :  { %4318 = vmatmul.mubr.msk.f32.vlgmr.msra.gmra.mrb[6].mxu0 %vm388_vm1, %v4309_v3 }
 0x7ad   :  { %v4314_v6 = vpop.f32.mrb[16].mxu0  ;;  %4579 = vmatpush3.bf16.msra.mxu0 %v4576_v55 }
 0x7ae   :  { %v1504_v7 = vpop.f32.mrb[17].mxu0  ;;  %4581 = vmatprep.subr.bf16.mxu0 %v4580_v5 }
 0x7af   :  { %4320 = vmatprep.mubr.msk.f32.mxu0 %vm388_vm1, %v1504_v7 }
 0x7b0   :  { %4321 = vmatmul.mubr.msk.f32.gmra.mrb[8].mxu0 %vm388_vm1, %v4314_v6 }
 0x7b1   :  { %4583 = vmatpush3.bf16.msra.mxu0 %v4580_v5  ;;  %4345 = vmatprep.mubr.msk.f32.mxu0 %vm112_vm0, %v4994_v11  ;;  %v4333_v8 = vpop.f32.mrb[18].mxu1 }
 0x7b2   :  { %v1701_v10 = vadd.f32 %v4333_v8, %v3915_v9  ;;  %v1695_v12 = vpop.f32.mrb[19].mxu1 }
 0x7b3   :  { %v1696_v18 = vadd.f32 %v3915_v9, %v1695_v12  ;;  %v3962_v12 = vld [vmem:[%s5604_s7 + $0x68] sm:$0xff] }
 0x7b4   :  { %4346 = vmatmul.mubr.msk.f32.vlgmr.msra.gmra.mrb[18].mxu0 %vm112_vm0, %v5008_v14 }
 0x7b5   :  { %v4336_v19 = vpop.f32.mrb[20].mxu1  ;;  %4361 = vmatprep.mubr.msk.f32.mxu0 %vm388_vm1, %v1696_v18 }
 0x7b6   :  { %v1711_v20 = vadd.f32 %v4336_v19, %v3915_v9  ;;  %v1705_v21 = vpop.f32.mrb[21].mxu1  ;;  %v3951_v19 = vld [vmem:[%s5605_s0 + $0x60] sm:$0xff] }
 0x7b7   :  { %v1706_v22 = vadd.f32 %v3915_v9, %v1705_v21 }
 0x7b9   :  { %4366 = vmatprep.mubr.msk.f32.mxu1 %vm388_vm1, %v1706_v22  ;;  %v4358_v23 = vpop.f32.mrb[22].mxu1  ;;  %v3954_v22 = vld [vmem:[%s5605_s0 + $0x78] sm:$0xff] }
 0x7ba   :  { %v1881_v24 = vpop.f32.mrb[23].mxu1  ;;  %v1887_v30 = vadd.f32 %v4358_v23, %v3933_v26 }
 0x7bb   :  { %v1882_v32 = vadd.f32 %v3933_v26, %v1881_v24  ;;  %v3963_v24 = vld [vmem:[%s5604_s7 + $0x70] sm:$0xff] }
 0x887   :  { %v4347_v27 = vpop.f32.mrb[18].mxu0 }
 0x888   :  { %v1799_v28 = vadd.f32 %v4347_v27, %v3925_v25  ;;  %v1793_v29 = vpop.f32.mrb[19].mxu0 }
 0x889   :  { %v1794_v31 = vadd.f32 %v3925_v25, %v1793_v29  ;;  %v3964_v25 = vld [vmem:[%s5604_s7 + $0x78] sm:$0xff] }
 0x88a   :  { %4364 = vmatprep.subr.msk.mxu1 %vm388_vm1, %v1799_v28 }
 0x88b   :  { %4359 = vmatprep.subr.msk.mxu0 %vm388_vm1, %v1794_v31  ;;  %4365 = vmatpush3.xpose.msk.msra.mxu1 %vm388_vm1, %v1799_v28  ;;  %v3956_v28 = vld [vmem:[%s5609_s10 + $0x3] ss:$0 sm:$0xff] }
 0x88c   :  { %4360 = vmatpush3.xpose.msk.msra.mxu0 %vm388_vm1, %v1794_v31  ;;  %4374 = vmatprep.subr.mxu1 %v1887_v30 }
 0x88d   :  { %4369 = vmatprep.subr.mxu0 %v1882_v32 }
 0x88e   :  { %4367 = vmatmul.mubr.msk.f32.vlgmr.msra.gmra.mrb[24].mxu1 %vm388_vm1, %v1711_v20  ;;  %v3952_v20 = vld [vmem:[%s5605_s0 + $0x68] sm:$0xff] }
 0x88f   :  { %4362 = vmatmul.mubr.msk.f32.vlgmr.msra.gmra.mrb[20].mxu0 %vm388_vm1, %v1701_v10  ;;  %4375 = vmatpush3.msra.mxu1 %v1887_v30  ;;  %v3961_v10 = vld [vmem:[%s5604_s7 + $0x60] sm:$0xff]  ;;  %v4592_v21 = vpack.c.bf16 %v3952_v20, %v3951_v19 }
 0x890   :  { %4370 = vmatpush3.msra.mxu0 %v1882_v32  ;;  %v4600_v18 = vpack.c.bf16 %v3962_v12, %v3961_v10  ;;  %v3974_v12 = vld [vmem:[%s5611_s1 + $0x3] ss:$0 sm:$0xff]  ;;  %s5614_s1 = sld [smem:[#allocation11_spill]] }
 0x891   :  { %4379 = vmatprep.subr.mxu0 %v3946_v61  ;;  %4593 = vmatprep.subr.bf16.mxu1 %v4592_v21 }
 0x961   :  { %v4368_v33 = vpop.f32.mrb[24].mxu1 }
 0x962   :  { %v4363_v34 = vpop.f32.mrb[20].mxu0  ;;  %v2049_v35 = vpop.f32.mrb[25].mxu1  ;;  %v2067_v39 = vsel %vm388_vm1, %v4368_v33, -inf }
 0x963   :  { %v1965_v36 = vpop.f32.mrb[21].mxu0  ;;  %v2061_v37 = vsel %vm388_vm1, %v4363_v34, -inf  ;;  %v2064_v40 = vsel %vm388_vm1, %v2049_v35, -inf }
 0x964   :  { %2062 = vmax.xlane.f32.xlu1 %v2061_v37  ;;  %v2058_v38 = vsel %vm388_vm1, %v1965_v36, -inf }
 0x965   :  { %2059 = vmax.xlane.f32.xlu0 %v2058_v38 }
 0x968   :  { %2068 = vmax.xlane.f32.xlu1 %v2067_v39 }
 0x969   :  { %2065 = vmax.xlane.f32.xlu0 %v2064_v40 }
 0x9f1   :  { %v2063_v41 = vpop.xlane.xlu1 %2062 }
 0x9f2   :  { %v2071_v42 = vsub.f32 %v4363_v34, %v2063_v41  ;;  %v2060_v43 = vpop.xlane.xlu0 %2059  ;;  %v3969_v41 = vld [vmem:[%s5610_s27 + $0x60] sm:$0xff] }
 0x9f3   :  { %v2070_v44 = vsub.f32 %v1965_v36, %v2060_v43  ;;  %v3971_v43 = vld [vmem:[%s5610_s27 + $0x70] sm:$0xff] }
 0x9f4   :  { %v2076_v45 = vmul.f32 1.442695, %v2071_v42  ;;  %v3970_v42 = vld [vmem:[%s5610_s27 + $0x68] sm:$0xff] }
 0x9f5   :  { %v2074_v46 = vmul.f32 1.442695, %v2070_v44  ;;  %v2069_v47 = vpop.xlane.xlu1 %2068  ;;  %v4608_v44 = vpack.c.bf16 %v3970_v42, %v3969_v41  ;;  %v4777_v41 = vld [vmem:[%s5607_s2 + $0x18] sm:$0xff] }
 0x9f6   :  { %4711 = vpow2.f32 %v2076_v45  ;;  %v2073_v48 = vsub.f32 %v4368_v33, %v2069_v47  ;;  %v2066_v49 = vpop.xlane.xlu0 %2065  ;;  %v3972_v45 = vld [vmem:[%s5610_s27 + $0x78] sm:$0xff] }
 0x9f7   :  { %4713 = vpow2.f32 %v2074_v46  ;;  %v2072_v50 = vsub.f32 %v2049_v35, %v2066_v49  ;;  %v4612_v46 = vpack.c.bf16 %v3972_v45, %v3971_v43 }
 0x9f8   :  { %v2080_v51 = vmul.f32 1.442695, %v2073_v48 }
 0x9f9   :  { %v2078_v52 = vmul.f32 1.442695, %v2072_v50 }
 0x9fa   :  { %4715 = vpow2.f32 %v2080_v51 }
 0x9fb   :  { %4717 = vpow2.f32 %v2078_v52 }
 0xa00   :  { %v4712_v53 = vpop.eup %4711 }
 0xa01   :  { %v4714_v54 = vpop.eup %4713  ;;  %v2085_v55 = vsel %vm388_vm1, %v4712_v53, 0.0 }
 0xa02   :  { %2086 = vadd.xlane.f32.xlu1 %v2085_v55  ;;  %v2082_v56 = vsel %vm388_vm1, %v4714_v54, 0.0 }
 0xa03   :  { %2083 = vadd.xlane.f32.xlu0 %v2082_v56 }
 0xa04   :  { %v4716_v57 = vpop.eup %4715 }
 0xa05   :  { %v4718_v58 = vpop.eup %4717  ;;  %v2091_v59 = vsel %vm388_vm1, %v4716_v57, 0.0 }
 0xa06   :  { %2092 = vadd.xlane.f32.xlu1 %v2091_v59  ;;  %v2088_v60 = vsel %vm388_vm1, %v4718_v58, 0.0 }
 0xa07   :  { %2089 = vadd.xlane.f32.xlu0 %v2088_v60 }
 0xa8f   :  { %v2087_v62 = vpop.xlane.xlu1 %2086 }
 0xa90   :  { %4719 = vrcp.f32 %v2087_v62  ;;  %v2084_v63 = vpop.xlane.xlu0 %2083 }
 0xa91   :  { %4721 = vrcp.f32 %v2084_v63 }
 0xa93   :  { %v2093_v0 = vpop.xlane.xlu1 %2092 }
 0xa94   :  { %4723 = vrcp.f32 %v2093_v0  ;;  %v2090_v1 = vpop.xlane.xlu0 %2089 }
 0xa95   :  { %4725 = vrcp.f32 %v2090_v1 }
 0xa9a   :  { %v4720_v2 = vpop.eup %4719 }
 0xa9b   :  { %v4722_v3 = vpop.eup %4721  ;;  %v2099_v5 = vmul.f32 %v4720_v2, %v4712_v53 }
 0xa9c   :  { %v2098_v4 = vmul.f32 %v4722_v3, %v4714_v54 }
 0xa9e   :  { %v4724_v6 = vpop.eup %4723  ;;  %4371 = vmatprep.mubr.msk.f32.mxu0 %vm388_vm1, %v2098_v4 }
 0xa9f   :  { %v4726_v7 = vpop.eup %4725  ;;  %4372 = vmatmul.mubr.msk.f32.vlgmr.msra.gmra.mrb[22].mxu0 %vm388_vm1, %v2099_v5  ;;  %v2101_v9 = vmul.f32 %v4724_v6, %v4716_v57 }
 0xaa0   :  { %v2100_v8 = vmul.f32 %v4726_v7, %v4718_v58  ;;  %4380 = vmatpush3.msra.mxu0 %v3946_v61 }
 0xaa1   :  { %4601 = vmatprep.subr.bf16.mxu0 %v4600_v18 }
 0xaa2   :  { %4376 = vmatprep.mubr.msk.f32.mxu1 %vm388_vm1, %v2100_v8 }
 0xaa3   :  { %4377 = vmatmul.mubr.msk.f32.vlgmr.msra.gmra.mrb[26].mxu1 %vm388_vm1, %v2101_v9 }
 0xaa4   :  { %4395 = vmatprep.mubr.msk.f32.mxu1 %vm112_vm0, %v5001_v13  ;;  %4595 = vmatpush3.bf16.msra.mxu1 %v4592_v21  ;;  %v3953_v13 = vld [vmem:[%s5605_s0 + $0x70] sm:$0xff]  ;;  %v3987_v21 = vld [vmem:[%s5565_s11 + $0x18] sm:$0xff] }
 0xaa5   :  { %v4596_v23 = vpack.c.bf16 %v3954_v22, %v3953_v13 }
 0xaa7   :  { %4597 = vmatprep.subr.bf16.mxu1 %v4596_v23 }
 0xaa8   :  { %4599 = vmatpush3.bf16.msra.mxu1 %v4596_v23 }
 0xaa9   :  { %4609 = vmatprep.subr.bf16.mxu1 %v4608_v44 }
 0xaab   :  { %4396 = vmatmul.mubr.msk.f32.vlgmr.msra.gmra.mrb[28].mxu1 %vm112_vm0, %v5013_v15  ;;  %v4604_v15 = vpack.c.bf16 %v3964_v25, %v3963_v24 }
 0xaac   :  { %4398 = vmatprep.mubr.msk.f32.mxu1 %vm112_vm0, %v5018_v16  ;;  %4611 = vmatpush3.bf16.msra.mxu1 %v4608_v44  ;;  %v4778_v44 = vld [vmem:[%s5607_s2 + $0x10] sm:$0xff] }
 0xaad   :  { %4613 = vmatprep.subr.bf16.mxu1 %v4612_v46 }
 0xaaf   :  { %4399 = vmatmul.mubr.msk.f32.gmra.mrb[30].mxu1 %vm112_vm0, %v5029_v17 }
 0xab0   :  { %4420 = vmatprep.mubr.msk.f32.mxu1 %vm112_vm0, %v4994_v11  ;;  %4615 = vmatpush3.bf16.msra.mxu1 %v4612_v46 }
 0xab3   :  { %4421 = vmatmul.mubr.msk.f32.vlgmr.msra.gmra.mrb[32].mxu1 %vm112_vm0, %v5008_v14 }
 0xb72   :  { %v4373_v26 = vpop.f32.mrb[22].mxu0 }
 0xb73   :  { %v2174_v27 = vpop.f32.mrb[23].mxu0 }
 0xb74   :  { %4381 = vmatprep.mubr.msk.f32.mxu0 %vm388_vm1, %v2174_v27 }
 0xb75   :  { %4382 = vmatmul.mubr.msk.f32.vlgmr.msra.gmra.mrb[6].mxu0 %vm388_vm1, %v4373_v26 }
 0xb76   :  { %v4378_v16 = vpop.f32.mrb[26].mxu1  ;;  %4603 = vmatpush3.bf16.msra.mxu0 %v4600_v18 }
 0xb77   :  { %v2255_v17 = vpop.f32.mrb[27].mxu1  ;;  %4605 = vmatprep.subr.bf16.mxu0 %v4604_v15 }
 0xb78   :  { %4384 = vmatprep.mubr.msk.f32.mxu0 %vm388_vm1, %v2255_v17 }
 0xb79   :  { %4385 = vmatmul.mubr.msk.f32.gmra.mrb[8].mxu0 %vm388_vm1, %v4378_v16 }
 0xb7a   :  { %4607 = vmatpush3.bf16.msra.mxu0 %v4604_v15  ;;  %4409 = vmatprep.mubr.msk.f32.mxu0 %vm112_vm0, %v4994_v11  ;;  %v3966_v11 = vld [vmem:[%s5608_s9 + $0x3] ss:$0 sm:$0xff] }
 0xb7d   :  { %4410 = vmatmul.mubr.msk.f32.vlgmr.msra.gmra.mrb[24].mxu0 %vm112_vm0, %v5008_v14 }
 0xb7e   :  { %v4397_v29 = vpop.f32.mrb[28].mxu1 }
 0xb7f   :  { %v2452_v30 = vadd.f32 %v4397_v29, %v3956_v28  ;;  %v2446_v31 = vpop.f32.mrb[29].mxu1 }
 0xb80   :  { %v2447_v32 = vadd.f32 %v3956_v28, %v2446_v31 }
 0xb82   :  { %v4400_v33 = vpop.f32.mrb[30].mxu1  ;;  %4425 = vmatprep.mubr.msk.f32.mxu0 %vm388_vm1, %v2447_v32 }
 0xb83   :  { %v2462_v34 = vadd.f32 %v4400_v33, %v3956_v28  ;;  %v2456_v35 = vpop.f32.mrb[31].mxu1 }
 0xb84   :  { %v2457_v36 = vadd.f32 %v3956_v28, %v2456_v35  ;;  %v4775_v35 = vld [vmem:[%s5607_s2 + $0x8] sm:$0xff] }
 0xb86   :  { %v4422_v10 = vpop.f32.mrb[32].mxu1 }
 0xb87   :  { %v2632_v18 = vpop.f32.mrb[33].mxu1  ;;  %v2638_v19 = vadd.f32 %v4422_v10, %v3974_v12  ;;  %v3194_v10 = vld [vmem:[%s5569_s15 + $0x8] sm:$0xff] }
 0xb88   :  { %v2633_v20 = vadd.f32 %v3974_v12, %v2632_v18  ;;  %v3195_v18 = vld [vmem:[%s5569_s15 + $0x10] sm:$0xff] }
 0xb8a   :  { %4433 = vmatprep.subr.mxu1 %v2633_v20 }
 0xb8b   :  { %4434 = vmatpush3.msra.mxu1 %v2633_v20 }
 0xc50   :  { %v4411_v37 = vpop.f32.mrb[24].mxu0 }
 0xc51   :  { %v2544_v38 = vpop.f32.mrb[25].mxu0  ;;  %v2550_v40 = vadd.f32 %v4411_v37, %v3966_v11 }
 0xc52   :  { %v2545_v39 = vadd.f32 %v3966_v11, %v2544_v38  ;;  %v4776_v11 = vld [vmem:[%s5607_s2] sm:$0xff] }
 0xc54   :  { %4423 = vmatprep.subr.msk.mxu0 %vm388_vm1, %v2545_v39 }
 0xc55   :  { %4424 = vmatpush3.xpose.msk.msra.mxu0 %vm388_vm1, %v2545_v39 }
 0xc56   :  { %4428 = vmatprep.subr.msk.mxu0 %vm388_vm1, %v2550_v40 }
 0xc58   :  { %4426 = vmatmul.mubr.msk.f32.vlgmr.msra.gmra.mrb[26].mxu0 %vm388_vm1, %v2452_v30 }
 0xc59   :  { %4429 = vmatpush3.xpose.msk.msra.mxu0 %vm388_vm1, %v2550_v40  ;;  %4430 = vmatprep.mubr.msk.f32.mxu0 %vm388_vm1, %v2457_v36 }
 0xc5a   :  { %4438 = vmatprep.subr.mxu0 %v2638_v19 }
 0xc5c   :  { %4431 = vmatmul.mubr.msk.f32.vlgmr.msra.gmra.mrb[28].mxu0 %vm388_vm1, %v2462_v34  ;;  %v3843_v34 = vld [vmem:[%s5566_s12] ss:$0 sm:$0xff] }
 0xc5d   :  { %4439 = vmatpush3.msra.mxu0 %v2638_v19  ;;  %v98_v36 = vadd.f32 %v4775_v35, %v3843_v34  ;;  %v97_v37 = vadd.f32 %v4776_v11, %v3843_v34  ;;  %v100_v42 = vadd.f32 %v4777_v41, %v3843_v34  ;;  %v99_v45 = vadd.f32 %v4778_v44, %v3843_v34  ;;  %v3196_v19 = vld [vmem:[%s5569_s15 + $0x18] sm:$0xff] }
 0xc5e   :  { %4443 = vmatprep.subr.mxu0 %v3987_v21  ;;  %v4620_v20 = vpack.c.bf16 %v3196_v19, %v3195_v18 }
 0xd2b   :  { %v4427_v47 = vpop.f32.mrb[26].mxu0 }
 0xd2c   :  { %v2716_v48 = vpop.f32.mrb[27].mxu0  ;;  %v2812_v49 = vsel %vm388_vm1, %v4427_v47, -inf }
 0xd2d   :  { %2813 = vmax.xlane.f32.xlu1 %v2812_v49  ;;  %v2809_v50 = vsel %vm388_vm1, %v2716_v48, -inf }
 0xd2e   :  { %2810 = vmax.xlane.f32.xlu0 %v2809_v50 }
 0xd2f   :  { %v4432_v51 = vpop.f32.mrb[28].mxu0 }
 0xd30   :  { %v2800_v52 = vpop.f32.mrb[29].mxu0  ;;  %v2818_v53 = vsel %vm388_vm1, %v4432_v51, -inf }
 0xd31   :  { %2819 = vmax.xlane.f32.xlu1 %v2818_v53  ;;  %v2815_v54 = vsel %vm388_vm1, %v2800_v52, -inf }
 0xd32   :  { %2816 = vmax.xlane.f32.xlu0 %v2815_v54 }
 0xdba   :  { %v2814_v55 = vpop.xlane.xlu1 %2813 }
 0xdbb   :  { %v2822_v56 = vsub.f32 %v4427_v47, %v2814_v55  ;;  %v2811_v57 = vpop.xlane.xlu0 %2810 }
 0xdbc   :  { %v2821_v14 = vsub.f32 %v2716_v48, %v2811_v57 }
 0xdbd   :  { %v2827_v58 = vmul.f32 1.442695, %v2822_v56 }
 0xdbe   :  { %v2825_v59 = vmul.f32 1.442695, %v2821_v14  ;;  %v2820_v60 = vpop.xlane.xlu1 %2819 }
 0xdbf   :  { %4727 = vpow2.f32 %v2827_v58  ;;  %v2824_v61 = vsub.f32 %v4432_v51, %v2820_v60  ;;  %v2817_v62 = vpop.xlane.xlu0 %2816 }
 0xdc0   :  { %4729 = vpow2.f32 %v2825_v59  ;;  %v2823_v63 = vsub.f32 %v2800_v52, %v2817_v62 }
 0xdc1   :  { %v2831_v0 = vmul.f32 1.442695, %v2824_v61 }
 0xdc2   :  { %v2829_v1 = vmul.f32 1.442695, %v2823_v63 }
 0xdc3   :  { %4731 = vpow2.f32 %v2831_v0 }
 0xdc4   :  { %4733 = vpow2.f32 %v2829_v1 }
 0xdc9   :  { %v4728_v2 = vpop.eup %4727 }
 0xdca   :  { %v4730_v3 = vpop.eup %4729  ;;  %v2836_v4 = vsel %vm388_vm1, %v4728_v2, 0.0 }
 0xdcb   :  { %2837 = vadd.xlane.f32.xlu1 %v2836_v4  ;;  %v2833_v5 = vsel %vm388_vm1, %v4730_v3, 0.0 }
 0xdcc   :  { %2834 = vadd.xlane.f32.xlu0 %v2833_v5 }
 0xdcd   :  { %v4732_v6 = vpop.eup %4731 }
 0xdce   :  { %v4734_v7 = vpop.eup %4733  ;;  %v2842_v8 = vsel %vm388_vm1, %v4732_v6, 0.0 }
 0xdcf   :  { %2843 = vadd.xlane.f32.xlu1 %v2842_v8  ;;  %v2839_v9 = vsel %vm388_vm1, %v4734_v7, 0.0 }
 0xdd0   :  { %2840 = vadd.xlane.f32.xlu0 %v2839_v9  ;;  %v3193_v9 = vld [vmem:[%s5569_s15] sm:$0xff]  ;;  %s5612_s15 = sld [smem:[#allocation10_spill]] }
 0xdd1   :  { %v4616_v12 = vpack.c.bf16 %v3194_v10, %v3193_v9  ;;  %v3671_v9 = vld [vmem:[%s5577_s23 + $0x18] sm:$0xff] }
 0xdd3   :  { %4617 = vmatprep.subr.bf16.mxu1 %v4616_v12 }
 0xe58   :  { %v2838_v13 = vpop.xlane.xlu1 %2837 }
 0xe59   :  { %4735 = vrcp.f32 %v2838_v13  ;;  %v2835_v22 = vpop.xlane.xlu0 %2834  ;;  %v3306_v13 = vld [vmem:[%s5571_s17 + $0x8] sm:$0xff] }
 0xe5a   :  { %4737 = vrcp.f32 %v2835_v22  ;;  %v3307_v22 = vld [vmem:[%s5571_s17 + $0x10] sm:$0xff] }
 0xe5c   :  { %v2844_v23 = vpop.xlane.xlu1 %2843 }
 0xe5d   :  { %4739 = vrcp.f32 %v2844_v23  ;;  %v2841_v24 = vpop.xlane.xlu0 %2840 }
 0xe5e   :  { %4741 = vrcp.f32 %v2841_v24  ;;  %v3308_v24 = vld [vmem:[%s5571_s17 + $0x18] sm:$0xff] }
 0xe63   :  { %v4736_v25 = vpop.eup %4735 }
 0xe64   :  { %v4738_v26 = vpop.eup %4737  ;;  %v2850_v15 = vmul.f32 %v4736_v25, %v4728_v2  ;;  %v4628_v25 = vpack.c.bf16 %v3308_v24, %v3307_v22 }
 0xe65   :  { %v2849_v27 = vmul.f32 %v4738_v26, %v4730_v3  ;;  %v3309_v26 = vld [vmem:[%s5571_s17 + $0x20] sm:$0xff] }
 0xe67   :  { %v4740_v16 = vpop.eup %4739  ;;  %4435 = vmatprep.mubr.msk.f32.mxu1 %vm388_vm1, %v2849_v27  ;;  %v3310_v27 = vld [vmem:[%s5571_s17 + $0x28] sm:$0xff] }
 0xe68   :  { %v4742_v17 = vpop.eup %4741  ;;  %4436 = vmatmul.mubr.msk.f32.vlgmr.msra.gmra.mrb[34].mxu1 %vm388_vm1, %v2850_v15  ;;  %v2852_v29 = vmul.f32 %v4740_v16, %v4732_v6  ;;  %v4632_v15 = vpack.c.bf16 %v3310_v27, %v3309_v26 }
 0xe69   :  { %v2851_v28 = vmul.f32 %v4742_v17, %v4734_v7  ;;  %4619 = vmatpush3.bf16.msra.mxu1 %v4616_v12 }
 0xe6a   :  { %4621 = vmatprep.subr.bf16.mxu1 %v4620_v20 }
 0xe6b   :  { %4440 = vmatprep.mubr.msk.f32.mxu0 %vm388_vm1, %v2851_v28 }
 0xe6c   :  { %4441 = vmatmul.mubr.msk.f32.vlgmr.msra.gmra.mrb[30].mxu0 %vm388_vm1, %v2852_v29 }
 0xe6d   :  { %4444 = vmatpush3.msra.mxu0 %v3987_v21  ;;  %4623 = vmatpush3.bf16.msra.mxu1 %v4620_v20  ;;  %v3305_v21 = vld [vmem:[%s5571_s17] sm:$0xff] }
 0xe6e   :  { %v4624_v23 = vpack.c.bf16 %v3306_v13, %v3305_v21  ;;  %v3667_v20 = vld [vmem:[%s5612_s15] sm:$0x3] }
 0xe6f   :  { %v3999_v21 = vld [vmem:[%s5572_s18] ss:$0 sm:$0xff] }
 0xe70   :  { %4625 = vmatprep.subr.bf16.mxu0 %v4624_v23 }
 0xf3b   :  { %v4437_v30 = vpop.f32.mrb[34].mxu1 }
 0xf3c   :  { %v2925_v31 = vpop.f32.mrb[35].mxu1 }
 0xf3d   :  { %4445 = vmatprep.mubr.msk.f32.mxu0 %vm388_vm1, %v2925_v31 }
 0xf3e   :  { %4446 = vmatmul.mubr.msk.f32.vlgmr.msra.gmra.mrb[6].mxu0 %vm388_vm1, %v4437_v30 }
 0xf3f   :  { %v4442_v32 = vpop.f32.mrb[30].mxu0  ;;  %4627 = vmatpush3.bf16.msra.mxu0 %v4624_v23 }
 0xf40   :  { %v3006_v33 = vpop.f32.mrb[31].mxu0  ;;  %4629 = vmatprep.subr.bf16.mxu0 %v4628_v25 }
 0xf41   :  { %4448 = vmatprep.mubr.msk.f32.mxu0 %vm388_vm1, %v3006_v33 }
 0xf42   :  { %4449 = vmatmul.mubr.msk.f32.gmra.mrb[8].mxu0 %vm388_vm1, %v4442_v32 }
 0xf43   :  { %4631 = vmatpush3.bf16.msra.mxu0 %v4628_v25 }
 0xf44   :  { %4633 = vmatprep.subr.bf16.mxu0 %v4632_v15 }
 0xf47   :  { %4635 = vmatpush3.bf16.msra.mxu0 %v4632_v15 }
0x1011   :  { %v4447_v38 = vpop.f32.mrb[6].mxu0 }
0x1012   :  { %v4658_v39 = vadd.f32 %v4447_v38, %v98_v36  ;;  %v3095_v40 = vpop.f32.mrb[7].mxu0  ;;  %v3992_v38 = vld [vmem:[%s5567_s13] ss:$0 sm:$0xff] }
0x1013   :  { %v4659_v43 = vadd.f32 %v3095_v40, %v97_v37 }
0x1014   :  { %v3123_v46 = vsel %vm112_vm0, %v4658_v39, 0.0 }
0x1015   :  { %3124 = vadd.xlane.f32.xlu1 %v3123_v46  ;;  %v4450_v47 = vpop.f32.mrb[8].mxu0  ;;  %v3120_v48 = vsel %vm112_vm0, %v4659_v43, 0.0 }
0x1016   :  { %v4660_v49 = vadd.f32 %v4450_v47, %v100_v42  ;;  %v3105_v50 = vpop.f32.mrb[9].mxu0  ;;  %3121 = vadd.xlane.f32.xlu0 %v3120_v48  ;;  %v3993_v42 = vld [vmem:[%s5568_s14] ss:$0 sm:$0xff] }
0x1017   :  { %v4661_v51 = vadd.f32 %v3105_v50, %v99_v45 }
0x1018   :  { %v3129_v52 = vsel %vm112_vm0, %v4660_v49, 0.0 }
0x1019   :  { %3130 = vadd.xlane.f32.xlu1 %v3129_v52  ;;  %v3126_v53 = vsel %vm112_vm0, %v4661_v51, 0.0 }
0x101a   :  { %3127 = vadd.xlane.f32.xlu0 %v3126_v53 }
0x10a2   :  { %v3125_v54 = vpop.xlane.xlu1 %3124 }
0x10a3   :  { %v3134_v55 = vmul.f32 0.03125, %v3125_v54  ;;  %v3122_v56 = vpop.xlane.xlu0 %3121 }
0x10a4   :  { %v3133_v57 = vmul.f32 0.03125, %v3122_v56  ;;  %v3312_v56 = vld [vmem:[%s5571_s17 + $0x38] sm:$0xff] }
0x10a5   :  { %v5368_v14 = vsub.f32 %v4658_v39, %v3134_v55  ;;  %v3311_v55 = vld [vmem:[%s5571_s17 + $0x30] sm:$0xff] }
0x10a6   :  { %v5370_v58 = vsub.f32 %v4659_v43, %v3133_v57  ;;  %v3131_v59 = vpop.xlane.xlu1 %3130  ;;  %v4636_v57 = vpack.c.bf16 %v3312_v56, %v3311_v55 }
0x10a7   :  { %v3136_v60 = vmul.f32 0.03125, %v3131_v59  ;;  %v3128_v61 = vpop.xlane.xlu0 %3127  ;;  %v3142_v62 = vmul.f32 %v5368_v14, %v5368_v14  ;;  %v3994_v59 = vld [vmem:[%s5570_s16] ss:$0 sm:$0xff] }
0x10a8   :  { %v3135_v63 = vmul.f32 0.03125, %v3128_v61  ;;  %v3141_v0 = vmul.f32 %v5370_v58, %v5370_v58  ;;  %4637 = vmatprep.subr.bf16.mxu0 %v4636_v57 }
0x10a9   :  { %v5376_v1 = vsub.f32 %v4660_v49, %v3136_v60  ;;  %v3148_v2 = vsel %vm112_vm0, %v3142_v62, 0.0  ;;  %4639 = vmatpush3.bf16.msra.mxu0 %v4636_v57 }
0x10aa   :  { %v5379_v3 = vsub.f32 %v4661_v51, %v3135_v63  ;;  %3149 = vadd.xlane.f32.xlu1 %v3148_v2  ;;  %v3145_v4 = vsel %vm112_vm0, %v3141_v0, 0.0  ;;  %v3668_v63 = vld [vmem:[%s5577_s23] sm:$0xff]  ;;  %v3669_v0 = vld [vmem:[%s5577_s23 + $0x8] sm:$0xff] }
0x10ab   :  { %3146 = vadd.xlane.f32.xlu0 %v3145_v4  ;;  %v3144_v5 = vmul.f32 %v5376_v1, %v5376_v1  ;;  %v4653_v4 = vpack.c.bf16 %v3669_v0, %v3668_v63 }
0x10ac   :  { %v3143_v6 = vmul.f32 %v5379_v3, %v5379_v3 }
0x10ad   :  { %v3154_v7 = vsel %vm112_vm0, %v3144_v5, 0.0 }
0x10ae   :  { %3155 = vadd.xlane.f32.xlu1 %v3154_v7  ;;  %v3151_v8 = vsel %vm112_vm0, %v3143_v6, 0.0 }
0x10af   :  { %3152 = vadd.xlane.f32.xlu0 %v3151_v8  ;;  %v3670_v8 = vld [vmem:[%s5577_s23 + $0x10] sm:$0xff] }
0x10b0   :  { %v4656_v18 = vpack.c.bf16 %v3671_v9, %v3670_v8 }
0x1137   :  { %v3150_v16 = vpop.xlane.xlu1 %3149 }
0x1138   :  { %v3158_v17 = vmul.f32 0.03125, %v3150_v16  ;;  %v3147_v28 = vpop.xlane.xlu0 %3146 }
0x1139   :  { %v3157_v29 = vmul.f32 0.03125, %v3147_v28 }
0x113a   :  { %v3162_v30 = vadd.f32 1e-05, %v3158_v17 }
0x113b   :  { %v3161_v31 = vadd.f32 1e-05, %v3157_v29  ;;  %v3156_v32 = vpop.xlane.xlu1 %3155 }
0x113c   :  { %4743 = vrsqrt.f32 %v3162_v30  ;;  %v3160_v33 = vmul.f32 0.03125, %v3156_v32  ;;  %v3153_v34 = vpop.xlane.xlu0 %3152 }
0x113d   :  { %4745 = vrsqrt.f32 %v3161_v31  ;;  %v3159_v35 = vmul.f32 0.03125, %v3153_v34 }
0x113e   :  { %v3164_v36 = vadd.f32 1e-05, %v3160_v33 }
0x113f   :  { %v3163_v11 = vadd.f32 1e-05, %v3159_v35 }
0x1140   :  { %4747 = vrsqrt.f32 %v3164_v36 }
0x1141   :  { %4749 = vrsqrt.f32 %v3163_v11 }
0x1146   :  { %v4744_v37 = vpop.eup %4743 }
0x1147   :  { %v4746_v39 = vpop.eup %4745  ;;  %v3170_v40 = vmul.f32 %v4744_v37, %v5368_v14  ;;  %v4827_v14 = vmov 0.0|0.0  }
0x1148   :  { %v3169_v41 = vmul.f32 %v4746_v39, %v5370_v58  ;;  %4652 = vmatprep.subr.bf16.mxu0 %v4827_v14  ;;  %4640 = vmatprep.subr.bf16.mxu1 %v4827_v14  ;;  %v4829_v58 = vmov 0.0  }
0x1149   :  { %v3180_v43 = vmul.f32 %v3992_v38, %v3170_v40 }
0x114a   :  { %v4748_v44 = vpop.eup %4747  ;;  %v3179_v45 = vmul.f32 %v3992_v38, %v3169_v41 }
0x114b   :  { %v4750_v46 = vpop.eup %4749  ;;  %v3172_v47 = vmul.f32 %v4748_v44, %v5376_v1  ;;  %v3190_v50 = vadd.f32 %v3993_v42, %v3180_v43 }
0x114c   :  { %v3189_v48 = vadd.f32 %v3993_v42, %v3179_v45  ;;  %v3171_v49 = vmul.f32 %v4750_v46, %v5379_v3 }
0x114d   :  { %v3182_v51 = vmul.f32 %v3992_v38, %v3172_v47 }
0x114e   :  { %4459 = vmatprep.mubr.msk.f32.mxu1 %vm112_vm0, %v3189_v48  ;;  %v3181_v52 = vmul.f32 %v3992_v38, %v3171_v49  ;;  %v4009_v49 = vld [vmem:[%s5578_s24] ss:$0 sm:$0xff] }
0x114f   :  { %4460 = vmatmul.mubr.msk.f32.vlgmr.msra.gmra.mrb[36].mxu1 %vm112_vm0, %v3190_v50  ;;  %v3192_v54 = vadd.f32 %v3993_v42, %v3182_v51 }
0x1150   :  { %v3191_v53 = vadd.f32 %v3993_v42, %v3181_v52 }
0x1152   :  { %4462 = vmatprep.mubr.msk.f32.mxu1 %vm112_vm0, %v3191_v53 }
0x1153   :  { %4463 = vmatmul.mubr.msk.f32.gmra.mrb[38].mxu1 %vm112_vm0, %v3192_v54 }
0x1154   :  { %4495 = vmatprep.mubr.msk.f32.mxu1 %vm4828_vm2, %v4829_v58 }
0x1222   :  { %v4461_v60 = vpop.f32.mrb[36].mxu1 }
0x1223   :  { %v3288_v61 = vadd.f32 %v4461_v60, %v3994_v59  ;;  %v3282_v62 = vpop.f32.mrb[37].mxu1 }
0x1224   :  { %v3283_v1 = vadd.f32 %v3994_v59, %v3282_v62 }
0x1225   :  { %v3302_v5 = vmax.f32 %v3288_v61, 0.0 }
0x1226   :  { %v3301_v2 = vmax.f32 %v3283_v1, 0.0  ;;  %v4464_v3 = vpop.f32.mrb[38].mxu1 }
0x1227   :  { %v3298_v6 = vadd.f32 %v4464_v3, %v3994_v59  ;;  %v3292_v7 = vpop.f32.mrb[39].mxu1 }
0x1228   :  { %v3293_v10 = vadd.f32 %v3994_v59, %v3292_v7  ;;  %4481 = vmatprep.mubr.msk.f32.mxu0 %vm3320_vm3, %v3301_v2 }
0x1229   :  { %4482 = vmatmul.mubr.msk.f32.vlgmr.msra.gmra.mrb[32].mxu0 %vm3320_vm3, %v3302_v5  ;;  %v3304_v19 = vmax.f32 %v3298_v6, 0.0 }
0x122a   :  { %v3303_v12 = vmax.f32 %v3293_v10, 0.0  ;;  %4654 = vmatpush3.bf16.msra.mxu0 %v4653_v4 }
0x122b   :  { %4655 = vmatprep.subr.bf16.mxu0 %v4827_v14 }
0x122c   :  { %4484 = vmatprep.mubr.msk.f32.mxu0 %vm3320_vm3, %v3303_v12  ;;  %v4004_v12 = vld [vmem:[%s5573_s19] ss:$0 sm:$0xff] }
0x122d   :  { %4485 = vmatmul.mubr.msk.f32.gmra.mrb[34].mxu0 %vm3320_vm3, %v3304_v19 }
0x122e   :  { %4657 = vmatpush3.bf16.msra.mxu0 %v4656_v18  ;;  %4517 = vmatprep.mubr.msk.f32.mxu0 %vm4828_vm2, %v4829_v58 }
0x1231   :  { %4518 = vmatmul.mubr.msk.f32.vlgmr.msra.gmra.mrb[36].mxu0 %vm112_vm0, %v3667_v20 }
0x12fc   :  { %v4483_v13 = vpop.f32.mrb[32].mxu0 }
0x12fd   :  { %v3405_v22 = vadd.f32 %v4483_v13, %v3999_v21  ;;  %v3399_v23 = vpop.f32.mrb[33].mxu0 }
0x12fe   :  { %v3400_v24 = vadd.f32 %v3999_v21, %v3399_v23 }
0x12ff   :  { %v3419_v25 = vadd.f32 %v3405_v22, %v3190_v50 }
0x1300   :  { %v4486_v26 = vpop.f32.mrb[34].mxu0  ;;  %v3418_v27 = vadd.f32 %v3400_v24, %v3189_v48 }
0x1301   :  { %v3415_v15 = vadd.f32 %v4486_v26, %v3999_v21  ;;  %v3409_v16 = vpop.f32.mrb[35].mxu0  ;;  %v3427_v17 = vsel %vm112_vm0, %v3419_v25, 0.0 }
0x1302   :  { %v3410_v28 = vadd.f32 %v3999_v21, %v3409_v16  ;;  %3428 = vadd.xlane.f32.xlu1 %v3427_v17  ;;  %v3424_v29 = vsel %vm112_vm0, %v3418_v27, 0.0  ;;  %v4005_v21 = vld [vmem:[%s5574_s20] ss:$0 sm:$0xff] }
0x1303   :  { %3425 = vadd.xlane.f32.xlu0 %v3424_v29  ;;  %v3421_v30 = vadd.f32 %v3415_v15, %v3192_v54 }
0x1304   :  { %v3420_v31 = vadd.f32 %v3410_v28, %v3191_v53  ;;  %v3748_v34 = vpop.f32.mrb[36].mxu0 }
0x1305   :  { %v3433_v32 = vsel %vm112_vm0, %v3421_v30, 0.0  ;;  %v4519_v35 = vpop.f32.mrb[37].mxu0  ;;  %v3749_v53 = vadd.f32 %v4009_v49, %v3748_v34  ;;  %v3496_v34 = vld [vmem:[%s5613_s28] sm:$0x3]  ;;  %v3774_v49 = vlaneseq }
0x1306   :  { %3434 = vadd.xlane.f32.xlu1 %v3433_v32  ;;  %v3430_v33 = vsel %vm112_vm0, %v3420_v31, 0.0  ;;  %v3570_v35 = vld [vmem:[%s5575_s21] sm:$0xff] }
0x1307   :  { %3431 = vadd.xlane.f32.xlu0 %v3430_v33  ;;  %v3752_v57 = vsel %vm3654_vm4, %v3749_v53, -inf }
0x138f   :  { %v3429_v36 = vpop.xlane.xlu1 %3428 }
0x1390   :  { %v3437_v11 = vmul.f32 0.03125, %v3429_v36  ;;  %v3426_v37 = vpop.xlane.xlu0 %3425  ;;  %v3571_v36 = vld [vmem:[%s5575_s21 + $0x8] sm:$0xff] }
0x1391   :  { %v3436_v38 = vmul.f32 0.03125, %v3426_v37  ;;  %v4647_v37 = vpack.c.bf16 %v3571_v36, %v3570_v35 }
0x1392   :  { %v3441_v39 = vsub.f32 %v3419_v25, %v3437_v11  ;;  %v3572_v11 = vld [vmem:[%s5575_s21 + $0x10] sm:$0xff] }
0x1393   :  { %v3440_v40 = vsub.f32 %v3418_v27, %v3436_v38  ;;  %v3435_v41 = vpop.xlane.xlu1 %3434  ;;  %v3573_v38 = vld [vmem:[%s5575_s21 + $0x18] sm:$0xff] }
0x1394   :  { %v3439_v42 = vmul.f32 0.03125, %v3435_v41  ;;  %v3432_v43 = vpop.xlane.xlu0 %3431  ;;  %v3445_v44 = vmul.f32 %v3441_v39, %v3441_v39 }
0x1395   :  { %v3438_v45 = vmul.f32 0.03125, %v3432_v43  ;;  %v3444_v46 = vmul.f32 %v3440_v40, %v3440_v40 }
0x1396   :  { %v3443_v47 = vsub.f32 %v3421_v30, %v3439_v42  ;;  %v3451_v48 = vsel %vm112_vm0, %v3445_v44, 0.0 }
0x1397   :  { %v3442_v50 = vsub.f32 %v3420_v31, %v3438_v45  ;;  %3452 = vadd.xlane.f32.xlu1 %v3451_v48  ;;  %v3448_v51 = vsel %vm112_vm0, %v3444_v46, 0.0 }
0x1398   :  { %3449 = vadd.xlane.f32.xlu0 %v3448_v51  ;;  %v3447_v52 = vmul.f32 %v3443_v47, %v3443_v47 }
0x1399   :  { %v3446_v54 = vmul.f32 %v3442_v50, %v3442_v50 }
0x139a   :  { %v3457_v55 = vsel %vm112_vm0, %v3447_v52, 0.0 }
0x139b   :  { %3458 = vadd.xlane.f32.xlu1 %v3457_v55  ;;  %v3454_v56 = vsel %vm112_vm0, %v3446_v54, 0.0 }
0x139c   :  { %3455 = vadd.xlane.f32.xlu0 %v3454_v56 }
0x13a0   :  { %3753 = vmax.xlane.f32.xlu0 %v3752_v57 }
0x1424   :  { %v3453_v59 = vpop.xlane.xlu1 %3452 }
0x1425   :  { %v3461_v60 = vmul.f32 0.03125, %v3453_v59  ;;  %v3450_v61 = vpop.xlane.xlu0 %3449 }
0x1426   :  { %v3460_v62 = vmul.f32 0.03125, %v3450_v61 }
0x1427   :  { %v3465_v63 = vadd.f32 1e-05, %v3461_v60 }
0x1428   :  { %v3464_v0 = vadd.f32 1e-05, %v3460_v62  ;;  %v3459_v1 = vpop.xlane.xlu1 %3458 }
0x1429   :  { %4751 = vrsqrt.f32 %v3465_v63  ;;  %v3463_v2 = vmul.f32 0.03125, %v3459_v1  ;;  %v3456_v3 = vpop.xlane.xlu0 %3455  ;;  %v4007_v1 = vld [vmem:[%s5576_s22] ss:$0 sm:$0xff]  ;;  %s4830_s22 = smov [#allocation2]  }
0x142a   :  { %4753 = vrsqrt.f32 %v3464_v0  ;;  %v3462_v4 = vmul.f32 0.03125, %v3456_v3  ;;  %s3821_s26 = sshll.u32 %s4830_s22, 4  ;;  %s3822_s26 = int_to_ptr.vmem [resolvable:$true] %s3821_s26 }
0x142b   :  { %v3467_v5 = vadd.f32 1e-05, %v3463_v2  ;;  %s4779_s30 = scalar_lea.vmem %s3822_s26, 32  ;;  %p4784_p1 = scmp.lt.s32.totalorder %s3822_s26, %s3822_s26 }
0x142c   :  { %v3466_v6 = vadd.f32 1e-05, %v3462_v4  ;;  %p4780_p0 = scmp.ne.s32.totalorder %s3822_s26, %s4779_s30  ;;  %p4785_p2 = scmp.lt.s32.totalorder %s4779_s30, %s4779_s30 }
0x142d   :  { %4755 = vrsqrt.f32 %v3467_v5  ;;  %v3754_v7 = vpop.xlane.xlu0 %3753 }
0x142e   :  { %4757 = vrsqrt.f32 %v3466_v6  ;;  %v3755_v8 = vsub.f32 %v3749_v53, %v3754_v7  ;;  %p4786_p3 = por %p4785_p2, %p4784_p1 }
0x1430   :  { %v3756_v9 = vmul.f32 1.442695, %v3755_v8  ;;  %p4787_p4 = pnand %p4786_p3, %p4780_p0 }
0x1432   :  { %4759 = vpow2.f32 %v3756_v9 }
0x1433   :  { %v4752_v10 = vpop.eup %4751 }
0x1434   :  { %v4754_v18 = vpop.eup %4753  ;;  %v3473_v19 = vmul.f32 %v4752_v10, %v3441_v39  ;;  %v4650_v39 = vpack.c.bf16 %v3573_v38, %v3572_v11 }
0x1435   :  { %v3472_v20 = vmul.f32 %v4754_v18, %v3440_v40  ;;  %v3763_v40 = vld [vmem:[%s5614_s1] sm:$0x3] }
0x1436   :  { %v3483_v13 = vmul.f32 %v4004_v12, %v3473_v19  ;;  %v3764_v41 = vadd.f32 1e-20, %v3763_v40 }
0x1437   :  { %v4756_v22 = vpop.eup %4755  ;;  %v3482_v23 = vmul.f32 %v4004_v12, %v3472_v20 }
0x1438   :  { %v4758_v24 = vpop.eup %4757  ;;  %v3475_v25 = vmul.f32 %v4756_v22, %v3443_v47  ;;  %v3493_v26 = vadd.f32 %v4005_v21, %v3483_v13  ;;  %4761 = vlog2.f32 %v3764_v41 }
0x1439   :  { %v3474_v27 = vmul.f32 %v4758_v24, %v3442_v50  ;;  %v3492_v15 = vadd.f32 %v4005_v21, %v3482_v23 }
0x143a   :  { %v3485_v16 = vmul.f32 %v4004_v12, %v3475_v25 }
0x143b   :  { %v4641_v17 = vpack.c.bf16 %v3493_v26, %v3492_v15  ;;  %v3484_v28 = vmul.f32 %v4004_v12, %v3474_v27 }
0x143c   :  { %v4760_v29 = vpop.eup %4759  ;;  %v3495_v30 = vadd.f32 %v4005_v21, %v3485_v16 }
0x143d   :  { %4642 = vmatpush3.bf16.msra.mxu1 %v4641_v17  ;;  %v3758_v31 = vsel %vm3654_vm4, %v4760_v29, 0.0  ;;  %v3494_v32 = vadd.f32 %v4005_v21, %v3484_v28 }
0x143e   :  { %3759 = vadd.xlane.f32.xlu1 %v3758_v31  ;;  %4643 = vmatprep.subr.bf16.mxu1 %v4827_v14 }
0x143f   :  { %v4644_v33 = vpack.c.bf16 %v3495_v30, %v3494_v32 }
0x1441   :  { %4645 = vmatpush3.bf16.msra.mxu1 %v4644_v33 }
0x1442   :  { %4646 = vmatprep.subr.bf16.mxu1 %v4827_v14  ;;  %v4762_v42 = vpop.eup %4761 }
0x1443   :  { %v3766_v43 = vmul.f32 0.6931472, %v4762_v42 }
0x1444   :  { %4496 = vmatmul.mubr.msk.f32.vlgmr.msra.gmra.mrb[40].mxu1 %vm112_vm0, %v3496_v34 }
0x1445   :  { %4506 = vmatprep.mubr.msk.f32.mxu1 %vm4828_vm2, %v4829_v58  ;;  %4648 = vmatpush3.bf16.msra.mxu1 %v4647_v37  ;;  %v3767_v44 = vsub.f32 0.0, %v3766_v43 }
0x1446   :  { %4649 = vmatprep.subr.bf16.mxu1 %v4827_v14  ;;  %v5514_v14 = vand.u32 127, %v3774_v49 }
0x1447   :  { %v3768_v45 = vadd.f32 1e-20, %v3767_v44 }
0x1448   :  { %vm3776_vm5 = vcmp.lt.s32.totalorder %v5514_v14, 20 }
0x1449   :  { %4651 = vmatpush3.bf16.msra.mxu1 %v4650_v39  ;;  %4763 = vlog2.f32 %v3768_v45 }
0x1453   :  { %v4764_v47 = vpop.eup %4763 }
0x1454   :  { %v3770_v48 = vmul.f32 0.6931472, %v4764_v47 }
0x1456   :  { %v3771_v50 = vsub.f32 0.0, %v3770_v48 }
0x14cb   :  { %v3760_v46 = vpop.xlane.xlu1 %3759 }
0x14cc   :  { %4765 = vrcp.f32 %v3760_v46 }
0x14d6   :  { %v4766_v51 = vpop.eup %4765 }
0x14d7   :  { %v3762_v52 = vmul.f32 %v4766_v51, %v4760_v29 }
0x14d9   :  { %v3772_v53 = vadd.f32 %v3771_v50, %v3762_v52 }
0x14db   :  { %v3773_v54 = vmul.f32 3.3333333, %v3772_v53 }
0x14dd   :  { %v3777_v55 = vsel %vm3776_vm5, %v3773_v54, -1e+30 }
0x14de   :  { %v3778_v56 = vsel %vm3654_vm4, %v3777_v55, -inf }
0x14df   :  { %3779 = vmax.xlane.f32.xlu0 %v3778_v56 }
0x1517   :  { %v3566_v57 = vpop.f32.mrb[40].mxu1 }
0x1518   :  { %4507 = vmatmul.mubr.msk.f32.vlgmr.msra.gmra.mrb[42].mxu1 %vm112_vm0, %v3566_v57  ;;  %v4497_v59 = vpop.f32.mrb[41].mxu1 }
0x156c   :  { %v3780_v60 = vpop.xlane.xlu0 %3779 }
0x156d   :  { %v3781_v61 = vsub.f32 %v3777_v55, %v3780_v60 }
0x156f   :  { %v3782_v62 = vmul.f32 1.442695, %v3781_v61 }
0x1571   :  { %4767 = vpow2.f32 %v3782_v62 }
0x157b   :  { %v4768_v63 = vpop.eup %4767 }
0x157c   :  { %v3784_v0 = vsel %vm3654_vm4, %v4768_v63, 0.0 }
0x157d   :  { %3785 = vadd.xlane.f32.xlu1 %v3784_v0 }
0x15eb   :  { %v3650_v2 = vpop.f32.mrb[42].mxu1 }
0x15ec   :  { %v3651_v3 = vadd.f32 %v4007_v1, %v3650_v2  ;;  %v4508_v4 = vpop.f32.mrb[43].mxu1 }
0x15ee   :  { %v3655_v5 = vsel %vm3654_vm4, %v3651_v3, -inf }
0x15ef   :  { %3656 = vmax.xlane.f32.xlu1 %v3655_v5 }
0x160a   :  { %v3786_v6 = vpop.xlane.xlu1 %3785 }
0x160b   :  { %4769 = vrcp.f32 %v3786_v6 }
0x1615   :  { %v4770_v7 = vpop.eup %4769 }
0x1616   :  { %v3788_v8 = vmul.f32 %v4770_v7, %v4768_v63 }
0x1618   :  { %v3789_v9 = vsel %vm3654_vm4, %v3788_v8, -inf }
0x1619   :  { %3790 = vmax.xlane.f32.xlu0 %v3789_v9 }
0x167c   :  { %v3657_v10 = vpop.xlane.xlu1 %3656 }
0x167d   :  { %v3658_v12 = vsub.f32 %v3651_v3, %v3657_v10 }
0x167f   :  { %v3659_v18 = vmul.f32 1.442695, %v3658_v12 }
0x1681   :  { %4771 = vpow2.f32 %v3659_v18 }
0x168b   :  { %v4772_v19 = vpop.eup %4771 }
0x168c   :  { %v3661_v20 = vsel %vm3654_vm4, %v4772_v19, 0.0 }
0x168d   :  { %3662 = vadd.xlane.f32.xlu1 %v3661_v20 }
0x16a6   :  { %v3791_v21 = vpop.xlane.xlu0 %3790 }
0x16a7   :  { %vm3792_vm6 = vcmp.eq.f32.partialorder %v3788_v8, %v3791_v21 }
0x16a8   :  { %v3793_v13 = vsel %vm3792_vm6, %v5514_v14, 128 }
0x16a9   :  { %v3794_v22 = vsel %vm3654_vm4, %v3793_v13, 2147483647 }
0x16aa   :  { %v3796_v23 = vshra.s32 %v3794_v22, 16  ;;  %v3795_v15 = vand.u32 65535, %v3794_v22 }
0x16ac   :  { %v3798_v24 = vcvt.s32.f32 %v3796_v23  ;;  %v3797_v17 = vcvt.s32.f32 %v3795_v15 }
0x16ae   :  { %3799 = vmin.xlane.f32.xlu0 %v3798_v24 }
0x171a   :  { %v3663_v25 = vpop.xlane.xlu1 %3662 }
0x171b   :  { %4773 = vrcp.f32 %v3663_v25 }
0x1725   :  { %v4774_v26 = vpop.eup %4773 }
0x1726   :  { %v3665_v27 = vmul.f32 %v4774_v26, %v4772_v19 }
0x1728   :  { %3666 = vst [vmem:[#allocation2] sm:$0x3] %v3665_v27 }
0x173b   :  { %v3800_v16 = vpop.xlane.xlu0 %3799 }
0x173c   :  { %vm3801_vm7 = vcmp.eq.f32.partialorder %v3798_v24, %v3800_v16 }
0x173d   :  { %v3802_v28 = vsel %vm3801_vm7, %v3797_v17, inf }
0x173e   :  { %3803 = vmin.xlane.f32.xlu0 %v3802_v28 }
0x173f   :  { %4790 = shalt.err (!%p4787_p4)
}
0x1740   :  { %s5615_s10 = sld [smem:[#allocation19_spill]] }
0x1746   :  { %s4791_s15 = scalar_lea.hbm %s5615_s10, 32 }
0x1747   :  { %p4792_p5 = scmp.ne.s32.totalorder %s5615_s10, %s4791_s15  ;;  %p4795_p6 = scmp.lt.u32.totalorder %s4791_s15, %s5615_s10 }
0x1749   :  { %p4797_p7 = pnand %p4795_p6, %p4792_p5 }
0x174b   :  { %4800 = shalt.err (!%p4797_p7)
}
0x174c   :  { %3824 = dma.vmem_to_hbm [thread:$0]  %s3822_s26, 32, %s5615_s10, [#allocation3]   ;;  %v3806_v29 = vcvt.f32.s32 %v3800_v16 }
0x174d   :  { %s4831_s2 = smov [#allocation4]  }
0x174e   :  { %v3807_v31 = vshll.u32 %v3806_v29, 16  ;;  %s3831_s3 = sshll.u32 %s4831_s2, 4  ;;  %s3832_s3 = int_to_ptr.vmem [resolvable:$true] %s3831_s3 }
0x174f   :  { %s4801_s19 = scalar_lea.vmem %s3832_s3, 32  ;;  %p4806_p9 = scmp.lt.s32.totalorder %s3832_s3, %s3832_s3 }
0x1750   :  { %p4802_p8 = scmp.ne.s32.totalorder %s3832_s3, %s4801_s19  ;;  %p4807_p10 = scmp.lt.s32.totalorder %s4801_s19, %s4801_s19 }
0x1752   :  { %p4808_p11 = por %p4807_p10, %p4806_p9 }
0x1754   :  { %p4809_p12 = pnand %p4808_p11, %p4802_p8 }
0x17cb   :  { %v3804_v30 = vpop.xlane.xlu0 %3803 }
0x17cc   :  { %v3805_v32 = vcvt.f32.s32 %v3804_v30 }
0x17ce   :  { %v3808_v33 = vadd.s32 %v3807_v31, %v3805_v32 }
0x17d0   :  { %vm3809_vm8 = vcmp.eq.s32.totalorder %v5514_v14, %v3808_v33 }
0x17d1   :  { %v4011_v34 = vsel %vm3809_vm8, 1.0, %v4829_v58 }
0x17d2   :  { %v3812_v35 = vsub.f32 %v4011_v34, %v3788_v8 }
0x17d4   :  { %v3813_v36 = vadd.f32 %v3812_v35, %v3788_v8 }
0x17d6   :  { %3814 = vst [vmem:[#allocation4] sm:$0x3] %v3813_v36 }
0x17d7   :  { %4812 = shalt.err (!%p4809_p12)
}
0x17d8   :  { %s5616_s8 = sld [smem:[#allocation20_spill]] }
0x17de   :  { %s4813_s13 = scalar_lea.hbm %s5616_s8, 32 }
0x17df   :  { %p4814_p13 = scmp.ne.s32.totalorder %s5616_s8, %s4813_s13  ;;  %p4817_p0 = scmp.lt.u32.totalorder %s4813_s13, %s5616_s8 }
0x17e1   :  { %p4819_p1 = pnand %p4817_p0, %p4814_p13 }
0x17e3   :  { %4822 = shalt.err (!%p4819_p1)
}
0x17e4   :  { %3834 = dma.vmem_to_hbm [thread:$0]  %s3832_s3, 32, %s5616_s8, [#allocation5]  }
0x17e5   :  { %4823 = dma.done.wait [#allocation3], 32  }
0x17e6   :  { %4824 = vsyncadd [#allocation3], 4294967264 }
0x17e7   :  { %4825 = dma.done.wait [#allocation5], 32  }
0x17e8   :  { %4826 = vsyncadd [#allocation5], 4294967264 }
0x17e9   :  { %3841 = vsyncpa [#allocation3], 1 }
0x17ea   :  { %3842 = vsyncpa [#allocation5], 1 }

</bundles_post_ra>
